<compile_context>
chip_gen: v7x
topology: tpu7x:2x2x1
jax: 0.10.0
libtpu: 0.0.40
codegen_flags: <defaults>
</compile_context>

<pallas_src>
import functools
import math

import numpy as np
import jax
import jax.numpy as jnp
from jax.experimental import pallas as pl
from jax.experimental.pallas import tpu as pltpu

LN_EPS = 1e-5        # LayerNormANE default eps
NEG_INF = -1e9       # large-negative additive mask value (avoids inf-inf NaNs)

_ON_TPU = jax.default_backend() == "tpu"
# bf16 MXU operands (f32 accumulation) on TPU; f32 elsewhere (interpret/CPU dot cannot
# execute BF16 x BF16 = F32 -- this was the previous failure).
_MM_DTYPE = jnp.bfloat16 if _ON_TPU else jnp.float32


def _tpu_config():
    """(vmem_limit_bytes, softmax exp dtype) derived from the local TPU generation."""
    if not _ON_TPU:
        return 48 * 1024 * 1024, jnp.float32
    kind = jax.devices()[0].device_kind.lower()
    gen = 0
    for g in (7, 6, 5, 4, 3, 2):
        if ("v%d" % g) in kind:
            gen = g
            break
    vmem_cap = None
    try:
        vmem_cap = int(pltpu.get_tpu_info().vmem_capacity_bytes)
    except Exception:
        pass
    if vmem_cap is None:
        vmem_cap = (64 if gen >= 7 else 128) * 1024 * 1024
    # leave headroom for Mosaic internal scratch (score / GELU temporaries)
    vmem_limit = max(32 * 1024 * 1024, min(vmem_cap - 12 * 1024 * 1024, 112 * 1024 * 1024))
    # v6e/v7x have bf16 VPU/EUP -> bf16 exp & weight multiply; keep f32 on v5e and older.
    exp_dtype = jnp.bfloat16 if gen >= 6 else jnp.float32
    return int(vmem_limit), exp_dtype


# ----------------------------- math helpers (usable inside the kernel) ---------------

def _recip(x):
    # EUP reciprocal on TPU (separate bundle slot, ~free); plain divide elsewhere.
    if _ON_TPU:
        return pl.reciprocal(x, approx=True)
    return 1.0 / x


def _erf_f32(x):
    # Eigen/XLA single-precision rational approximation of erf.  Built only from
    # mul/add/clamp plus an EUP reciprocal so it always lowers in Mosaic.
    x = jnp.clip(x, -4.0, 4.0)
    x2 = x * x
    p = jnp.float32(-2.72614225801306e-10)
    p = p * x2 + jnp.float32(2.77068142495902e-08)
    p = p * x2 + jnp.float32(-2.10102402082508e-06)
    p = p * x2 + jnp.float32(-5.69250639462346e-05)
    p = p * x2 + jnp.float32(-7.34990630326855e-04)
    p = p * x2 + jnp.float32(-2.95459980854025e-03)
    p = p * x2 + jnp.float32(-1.60960333262415e-02)
    p = x * p
    q = jnp.float32(-1.45660718464996e-05)
    q = q * x2 + jnp.float32(-2.13374055278905e-04)
    q = q * x2 + jnp.float32(-1.68282697438203e-03)
    q = q * x2 + jnp.float32(-7.37332916720468e-03)
    q = q * x2 + jnp.float32(-1.42647390514189e-02)
    return p * _recip(q)          # divide moved to the EUP slot (perf review)


def _gelu(x):
    # nn.GELU() default: 0.5 * x * (1 + erf(x / sqrt(2)))
    return 0.5 * x * (1.0 + _erf_f32(x * jnp.float32(1.0 / math.sqrt(2.0))))


def _layer_norm_ane(x, weight, bias):
    # x: (C, S); normalize over the channel axis (axis 0); ANE ordering (x_n + b) * w.
    mu = jnp.mean(x, axis=0, keepdims=True)
    zm = x - mu
    var = jnp.mean(zm * zm, axis=0, keepdims=True)
    normed = zm * jax.lax.rsqrt(var + jnp.float32(LN_EPS))
    return (normed + bias) * weight


# ----------------------------- Pallas kernels -----------------------------------------

def _qkv_kernel(x_ref, vec1_ref, wq_ref, wk_ref, wv_ref, q_ref, kt_ref, v_ref, *,
                mm_dtype):
    """LN1 + q/k/v 1x1-conv projections for one (C, TILE_S) slab of one batch element."""
    x = x_ref[0]                                   # (C, TILE_S) f32
    vecs = vec1_ref[...]                           # (C, 4): [ln1_w, ln1_b, bq*scale, bv]
    h = _layer_norm_ane(x, vecs[:, 0:1], vecs[:, 1:2])
    h_mm = h.astype(mm_dtype)
    q = jnp.dot(wq_ref[...], h_mm, preferred_element_type=jnp.float32) + vecs[:, 2:3]
    k = jnp.dot(wk_ref[...], h_mm, preferred_element_type=jnp.float32)   # key: bias=False
    v = jnp.dot(wv_ref[...], h_mm, preferred_element_type=jnp.float32) + vecs[:, 3:4]
    q_ref[0] = q.astype(mm_dtype)                  # 1/sqrt(D) already folded into wq/bq
    kt_ref[0] = k.astype(mm_dtype).T               # pre-transposed K: (TILE_S, C)
    v_ref[0] = v.astype(mm_dtype)


def _attn_mlp_kernel(*refs, n_head, has_mask, kv_len, mm_dtype, exp_dtype, mlp_chunks):
    """Attention of one q tile against the full key/value sequence, then the MLP."""
    if has_mask:
        (x_ref, q_ref, kt_ref, v_ref, mask_ref,
         wo_ref, vec2_ref, w1_ref, b1_ref, w2_ref, o_ref, wv_sc) = refs
    else:
        (x_ref, q_ref, kt_ref, v_ref,
         wo_ref, vec2_ref, w1_ref, b1_ref, w2_ref, o_ref, wv_sc) = refs
        mask_ref = None

    x = x_ref[0]                                   # (C, TILE_S) f32 residual input
    C, TS = x.shape
    D = C // n_head
    S_kv = kt_ref.shape[1]
    vecs = vec2_ref[...]                           # (C, 4): [bo, ln2_w, ln2_b, b2]

    # Additive score bias: (optional) streamed user mask + in-kernel key-padding bias.
    # Padding uses a -1e9 sentinel (not -inf) so summed biases never become inf-inf NaNs.
    bias = None
    if has_mask:
        bias = mask_ref[...].astype(jnp.float32)                       # (S_kv, TILE_S)
    if (kv_len is not None) and (kv_len < S_kv):
        kidx = jax.lax.broadcasted_iota(jnp.int32, (S_kv, 1), 0)
        pad = jnp.where(kidx < kv_len, 0.0, NEG_INF).astype(jnp.float32)
        bias = pad if bias is None else bias + pad

    # ---- self-attention: per-head, results accumulated into a (C, TILE_S) scratch ----
    # NOTE (perf review): the score matmul contracts over D (<=64), so attention is
    # MXU-underutilized on v6e/v7x; exp/softmax therefore runs in bf16 there (exp_dtype).
    for hd in range(n_head):
        lo, hi = hd * D, (hd + 1) * D
        qh = q_ref[0, lo:hi, :]                    # (D, TILE_S) pre-scaled by 1/sqrt(D)
        kt = kt_ref[0, :, lo:hi]                   # (S_kv, D)   K stored transposed
        vh = v_ref[0, lo:hi, :]                    # (D, S_kv)
        # scores[k, q] = sum_d k[d, k] * q_scaled[d, q]   ('bchq,bkhc->bkhq')
        s = jnp.dot(kt, qh, preferred_element_type=jnp.float32)        # (S_kv, TILE_S)
        if bias is not None:
            s = s + bias
        s = s - jnp.max(s, axis=0, keepdims=True)                      # softmax over keys
        e = jnp.exp(s.astype(exp_dtype))           # bf16 on v6e/v7x, f32 on v5e/CPU
        denom = jnp.sum(e, axis=0, keepdims=True, dtype=jnp.float32)
        w = (e * _recip(denom).astype(exp_dtype)).astype(mm_dtype)
        # wv[c, q] = sum_k w[k, q] * v[c, k]              ('bkhq,bchk->bchq')
        wv_sc[lo:hi, :] = jnp.dot(vh, w, preferred_element_type=jnp.float32
                                  ).astype(mm_dtype)

    attn = jnp.dot(wo_ref[...], wv_sc[...], preferred_element_type=jnp.float32) \
        + vecs[:, 0:1]
    x1 = x + attn

    # ---- MLP: x = x + conv2(gelu(conv1(mlp_ln(x)))) ----------------------------------
    # Hidden dim processed in chunks to bound the (n_mlp, TILE_S) GELU intermediate.
    h2 = _layer_norm_ane(x1, vecs[:, 1:2], vecs[:, 2:3])
    h2_mm = h2.astype(mm_dtype)

    def mlp_step(ci, acc):
        m = jnp.dot(w1_ref[ci], h2_mm, preferred_element_type=jnp.float32) + b1_ref[ci]
        m = _gelu(m)
        return acc + jnp.dot(w2_ref[ci], m.astype(mm_dtype),
                             preferred_element_type=jnp.float32)

    if mlp_chunks == 1:
        y = mlp_step(0, jnp.zeros_like(x1))
    else:
        y = jax.lax.fori_loop(0, mlp_chunks, mlp_step, jnp.zeros_like(x1))
    o_ref[0] = x1 + y + vecs[:, 3:4]


# ----------------------------- wrapper ------------------------------------------------

def _maybe_single_buffer(block_shape, index_map):
    """BlockSpec; single-buffered (pipeline_mode=pl.Buffered(1)) where supported.

    Grid-invariant (or per-batch-only) operands gain nothing from the default 2-deep
    pipeline, so single-buffering halves their VMEM footprint (perf review item #1/#2).
    Gated on running on a real TPU to keep the interpret path simple.
    """
    if _ON_TPU and hasattr(pl, "Buffered"):
        try:
            return pl.BlockSpec(block_shape, index_map, pipeline_mode=pl.Buffered(1))
        except TypeError:
            pass
    return pl.BlockSpec(block_shape, index_map)


def _const_spec(a):
    nd = a.ndim
    return _maybe_single_buffer(a.shape, lambda b, si, _n=nd: (0,) * _n)


def resblock_ane_forward(x_nchw, params, n_head, mask=None, *, tile_s=256, mlp_chunk=512):
    """x_nchw: (bs, dim, 1, seq_len) float32.  Returns the same shape.

    `mask` (optional) is an additive (seq_len, seq_len) mask in (key, query)
    orientation, matching MultiHeadAttentionANE's 'bkhq' score layout.
    """
    B, C, one, S = x_nchw.shape
    assert one == 1 and C % n_head == 0
    D = C // n_head

    vmem_limit, exp_dtype = _tpu_config()

    # ---- tile size / padding:  ts is a lane-dense multiple of 128; S is padded UP to a
    # multiple of ts (fixes the old fallback that collapsed ts to 128); the grid keeps at
    # least 2 points when possible so both v7x TensorCores get work.
    ts = max(128, (int(tile_s) // 128) * 128)
    ts = min(ts, ((S + 127) // 128) * 128)
    while ts > 128 and B * ((S + ts - 1) // ts) < 2:
        ts -= 128
    S_pad = ((S + ts - 1) // ts) * ts
    n_tiles = S_pad // ts

    x = x_nchw.reshape(B, C, S).astype(jnp.float32)
    if S_pad != S:
        x = jnp.pad(x, ((0, 0), (0, 0), (0, S_pad - S)))

    # Key padding is handled in-kernel (iota compare against the static valid length), so
    # the encoder path (mask=None) streams no mask at all.  A user mask is streamed in
    # the matmul dtype, tile-sized per q block.
    has_mask = mask is not None
    kv_len = S if S_pad != S else None
    m_full = None
    if has_mask:
        m_full = jnp.zeros((S_pad, S_pad), jnp.float32)
        m_full = m_full.at[:S, :S].set(jnp.asarray(mask, jnp.float32))
        m_full = m_full.astype(_MM_DTYPE)

    # ---- parameter prep: fold 1/sqrt(D) into wq/bq; matmul weights -> MM dtype; pack the
    # small per-channel vectors into one (C, 4) operand per pass (less lane-pad waste).
    scale = jnp.float32(float(D) ** -0.5)
    fv = lambda a: jnp.asarray(a, jnp.float32).reshape(-1, 1)
    fm = lambda a: jnp.asarray(a, jnp.float32).astype(_MM_DTYPE)

    vec1 = jnp.concatenate([fv(params["ln1_w"]), fv(params["ln1_b"]),
                            fv(params["bq"]) * scale, fv(params["bv"])], axis=1)   # (C,4)
    wq_s = (jnp.asarray(params["wq"], jnp.float32) * scale).astype(_MM_DTYPE)
    wk_m, wv_m, wo_m = fm(params["wk"]), fm(params["wv"]), fm(params["wo"])
    vec2 = jnp.concatenate([fv(params["bo"]), fv(params["ln2_w"]),
                            fv(params["ln2_b"]), fv(params["b2"])], axis=1)         # (C,4)

    n_mlp = int(params["w1"].shape[0])
    chunk = mlp_chunk if (n_mlp > mlp_chunk and n_mlp % mlp_chunk == 0) else n_mlp
    n_chunks = n_mlp // chunk
    w1c = fm(params["w1"]).reshape(n_chunks, chunk, C)
    b1c = jnp.asarray(params["b1"], jnp.float32).reshape(n_chunks, chunk, 1)
    w2c = fm(params["w2"]).reshape(C, n_chunks, chunk).transpose(1, 0, 2)   # (nc, C, chunk)

    cparams = pltpu.CompilerParams(
        dimension_semantics=("parallel", "parallel"),
        vmem_limit_bytes=vmem_limit,
    )

    cs_tile = lambda: pl.BlockSpec((1, C, ts), lambda b, si: (b, 0, si))
    kt_out_spec = pl.BlockSpec((1, ts, C), lambda b, si: (b, si, 0))

    # ---- pass 1: LN1 + q/k/v projections, tiled over (batch, S tile) -----------------
    p1_consts = [vec1, wq_s, wk_m, wv_m]
    q, k_t, v = pl.pallas_call(
        functools.partial(_qkv_kernel, mm_dtype=_MM_DTYPE),
        out_shape=(jax.ShapeDtypeStruct((B, C, S_pad), _MM_DTYPE),
                   jax.ShapeDtypeStruct((B, S_pad, C), _MM_DTYPE),
                   jax.ShapeDtypeStruct((B, C, S_pad), _MM_DTYPE)),
        grid=(B, n_tiles),
        in_specs=[cs_tile()] + [_const_spec(a) for a in p1_consts],
        out_specs=(cs_tile(), kt_out_spec, cs_tile()),
        compiler_params=cparams,
    )(x, *p1_consts)

    # ---- pass 2: attention (full-S keys/values) + MLP, tiled over (batch, S tile) ----
    in2 = [x, q, k_t, v]
    in2_specs = [cs_tile(), cs_tile(),
                 _maybe_single_buffer((1, S_pad, C), lambda b, si: (b, 0, 0)),
                 _maybe_single_buffer((1, C, S_pad), lambda b, si: (b, 0, 0))]
    if has_mask:
        in2.append(m_full)
        in2_specs.append(pl.BlockSpec((S_pad, ts), lambda b, si: (0, si)))
    p2_consts = [wo_m, vec2, w1c, b1c, w2c]
    in2 += p2_consts
    in2_specs += [_const_spec(a) for a in p2_consts]

    out = pl.pallas_call(
        functools.partial(_attn_mlp_kernel, n_head=n_head, has_mask=has_mask,
                          kv_len=kv_len, mm_dtype=_MM_DTYPE, exp_dtype=exp_dtype,
                          mlp_chunks=n_chunks),
        out_shape=jax.ShapeDtypeStruct((B, C, S_pad), jnp.float32),
        grid=(B, n_tiles),
        in_specs=in2_specs,
        out_specs=cs_tile(),
        scratch_shapes=[pltpu.VMEM((C, ts), _MM_DTYPE)],
        compiler_params=cparams,
    )(*in2)

    return out[:, :, :S].reshape(B, C, 1, S)


# ----------------------------- pure-JAX reference -------------------------------------

def resblock_reference(x, mask, p, n_head):
    # x: (B, C, S); mask: (S, S) additive in (key, query) orientation or None.
    B, C, S = x.shape
    D = C // n_head
    if mask is None:
        mask = jnp.zeros((S, S), jnp.float32)

    def ln(t, w, b):
        mu = t.mean(axis=1, keepdims=True)
        zm = t - mu
        var = (zm * zm).mean(axis=1, keepdims=True)
        return (zm / jnp.sqrt(var + LN_EPS) + b.reshape(1, C, 1)) * w.reshape(1, C, 1)

    scale = float(D) ** -0.5
    h = ln(x, p["ln1_w"], p["ln1_b"])
    q = jnp.einsum("oc,bcs->bos", p["wq"], h) + p["bq"].reshape(1, C, 1)
    k = jnp.einsum("oc,bcs->bos", p["wk"], h)
    v = jnp.einsum("oc,bcs->bos", p["wv"], h) + p["bv"].reshape(1, C, 1)
    q = q * scale
    qh = q.reshape(B, n_head, D, S)
    kh = k.reshape(B, n_head, D, S)
    vh = v.reshape(B, n_head, D, S)
    scores = jnp.einsum("bhdk,bhdq->bhkq", kh, qh) + mask[None, None]
    w = jax.nn.softmax(scores, axis=2)
    wv = jnp.einsum("bhdk,bhkq->bhdq", vh, w).reshape(B, C, S)
    attn = jnp.einsum("oc,bcs->bos", p["wo"], wv) + p["bo"].reshape(1, C, 1)
    x = x + attn
    h2 = ln(x, p["ln2_w"], p["ln2_b"])
    m = jnp.einsum("mc,bcs->bms", p["w1"], h2) + p["b1"].reshape(1, -1, 1)
    m = jax.nn.gelu(m, approximate=False)
    m = jnp.einsum("cm,bms->bcs", p["w2"], m) + p["b2"].reshape(1, C, 1)
    return x + m


# ----------------------------- demo ----------------------------------------------------

def make_params(key, n_state, n_mlp):
    ks = jax.random.split(key, 16)
    n = lambda k, shape, s: jax.random.normal(k, shape, jnp.float32) * s
    return {
        # LayerNormANE (attn_ln / mlp_ln): weight, bias of shape (C,), kept as (C,1)
        "ln1_w": 1.0 + n(ks[0], (n_state, 1), 0.05),
        "ln1_b": n(ks[1], (n_state, 1), 0.05),
        # MultiHeadAttentionANE: 1x1 Conv2d weights (C_out, C_in, 1, 1) -> (C_out, C_in)
        "wq": n(ks[2], (n_state, n_state), 0.05), "bq": n(ks[3], (n_state, 1), 0.02),
        "wk": n(ks[4], (n_state, n_state), 0.05),                       # key: bias=False
        "wv": n(ks[5], (n_state, n_state), 0.05), "bv": n(ks[6], (n_state, 1), 0.02),
        "wo": n(ks[7], (n_state, n_state), 0.05), "bo": n(ks[8], (n_state, 1), 0.02),
        "ln2_w": 1.0 + n(ks[9], (n_state, 1), 0.05),
        "ln2_b": n(ks[10], (n_state, 1), 0.05),
        # MLP (after replace_mlp: Linear -> 1x1 Conv2d over the channel axis)
        "w1": n(ks[11], (n_mlp, n_state), 0.05), "b1": n(ks[12], (n_mlp, 1), 0.02),
        "w2": n(ks[13], (n_state, n_mlp), 0.05), "b2": n(ks[14], (n_state, 1), 0.02),
    }


if __name__ == "__main__":
    bs, n_state, n_head = 2, 128, 4
    n_mlp = 4 * n_state

    root = jax.random.PRNGKey(0)
    k_x, k_p = jax.random.split(root)
    params = make_params(k_p, n_state, n_mlp)

    # Case 1: encoder-style -- lane-aligned seq_len, mask=None (no mask operand compiled).
    S1 = 256
    x1 = jax.random.normal(k_x, (bs, n_state, 1, S1), jnp.float32)   # (bs, dim, 1, seq_len)
    out1 = jax.block_until_ready(
        resblock_ane_forward(x1, params, n_head, mask=None, tile_s=128))
    ref1 = resblock_reference(x1.reshape(bs, n_state, S1), None, params, n_head)
    np.testing.assert_allclose(np.asarray(out1).reshape(bs, n_state, S1),
                               np.asarray(ref1), atol=2e-2, rtol=2e-2)

    # Case 2: decoder-style -- ragged seq_len (padded to a 128 multiple, key padding masked
    # in-kernel) + additive causal mask in (key, query) orientation.
    S2 = 200
    x2 = jax.random.normal(jax.random.fold_in(k_x, 1), (bs, n_state, 1, S2), jnp.float32)
    pos = jnp.arange(S2)
    causal_kq = jnp.where(pos[:, None] <= pos[None, :], 0.0, NEG_INF).astype(jnp.float32)
    out2 = jax.block_until_ready(
        resblock_ane_forward(x2, params, n_head, mask=causal_kq, tile_s=128))
    ref2 = resblock_reference(x2.reshape(bs, n_state, S2), causal_kq, params, n_head)
    np.testing.assert_allclose(np.asarray(out2).reshape(bs, n_state, S2),
                               np.asarray(ref2), atol=2e-2, rtol=2e-2)

    print("KERNEL_OK")
</pallas_src>

<mosaic_0001>
module attributes {stable_mosaic.version = 11 : i64} {
  func.func @_qkv_kernel(%arg0: i32, %arg1: i32, %arg2: memref<1x128x128xf32, #tpu.memory_space<vmem>>, %arg3: memref<128x4xf32, #tpu.memory_space<vmem>>, %arg4: memref<128x128xf32, #tpu.memory_space<vmem>>, %arg5: memref<128x128xf32, #tpu.memory_space<vmem>>, %arg6: memref<128x128xf32, #tpu.memory_space<vmem>>, %arg7: memref<1x128x128xf32, #tpu.memory_space<vmem>>, %arg8: memref<1x128x128xf32, #tpu.memory_space<vmem>>, %arg9: memref<1x128x128xf32, #tpu.memory_space<vmem>>) attributes {dimension_semantics = [#tpu.dimension_semantics<parallel>, #tpu.dimension_semantics<parallel>], iteration_bounds = array<i64: 2, 2>, scalar_prefetch = 0 : i64, scratch_operands = 0 : i64, tpu.core_type = #tpu.core_type<tc>, window_params = [{transform_indices = @transform_0, window_bounds = array<i64: 1, 128, 128>}, {pipeline_mode = #tpu.pipeline_mode<synchronous>, transform_indices = @transform_1, window_bounds = array<i64: 128, 4>}, {pipeline_mode = #tpu.pipeline_mode<synchronous>, transform_indices = @transform_2, window_bounds = array<i64: 128, 128>}, {pipeline_mode = #tpu.pipeline_mode<synchronous>, transform_indices = @transform_3, window_bounds = array<i64: 128, 128>}, {pipeline_mode = #tpu.pipeline_mode<synchronous>, transform_indices = @transform_4, window_bounds = array<i64: 128, 128>}, {transform_indices = @transform_5, window_bounds = array<i64: 1, 128, 128>}, {transform_indices = @transform_6, window_bounds = array<i64: 1, 128, 128>}, {transform_indices = @transform_7, window_bounds = array<i64: 1, 128, 128>}]} {
    %c0 = arith.constant 0 : index
    %c0_0 = arith.constant 0 : index
    %c0_1 = arith.constant 0 : index
    %0 = vector.load %arg2[%c0, %c0_0, %c0_1] : memref<1x128x128xf32, #tpu.memory_space<vmem>>, vector<1x128x128xf32>
    %1 = vector.shape_cast %0 : vector<1x128x128xf32> to vector<128x128xf32>
    %c0_2 = arith.constant 0 : index
    %c0_3 = arith.constant 0 : index
    %2 = vector.load %arg3[%c0_2, %c0_3] : memref<128x4xf32, #tpu.memory_space<vmem>>, vector<128x4xf32>
    %3 = vector.extract_strided_slice %2 {offsets = [0, 0], sizes = [128, 1], strides = [1, 1]} : vector<128x4xf32> to vector<128x1xf32>
    %4 = vector.extract_strided_slice %2 {offsets = [0, 1], sizes = [128, 1], strides = [1, 1]} : vector<128x4xf32> to vector<128x1xf32>
    %cst = arith.constant dense<0.000000e+00> : vector<128xf32>
    %5 = vector.multi_reduction <add>, %1, %cst [0] : vector<128x128xf32> to vector<128xf32>
    %6 = vector.shape_cast %5 : vector<128xf32> to vector<1x128xf32>
    %cst_4 = arith.constant 1.280000e+02 : f32
    %7 = vector.broadcast %cst_4 : f32 to vector<1x128xf32>
    %8 = arith.divf %6, %7 : vector<1x128xf32>
    %9 = vector.broadcast %8 : vector<1x128xf32> to vector<128x128xf32>
    %10 = arith.subf %1, %9 : vector<128x128xf32>
    %11 = arith.mulf %10, %10 : vector<128x128xf32>
    %cst_5 = arith.constant dense<0.000000e+00> : vector<128xf32>
    %12 = vector.multi_reduction <add>, %11, %cst_5 [0] : vector<128x128xf32> to vector<128xf32>
    %13 = vector.shape_cast %12 : vector<128xf32> to vector<1x128xf32>
    %cst_6 = arith.constant 1.280000e+02 : f32
    %14 = vector.broadcast %cst_6 : f32 to vector<1x128xf32>
    %15 = arith.divf %13, %14 : vector<1x128xf32>
    %cst_7 = arith.constant 9.99999974E-6 : f32
    %16 = vector.broadcast %cst_7 : f32 to vector<1x128xf32>
    %17 = arith.addf %15, %16 : vector<1x128xf32>
    %18 = math.rsqrt %17 : vector<1x128xf32>
    %19 = vector.broadcast %18 : vector<1x128xf32> to vector<128x128xf32>
    %20 = arith.mulf %10, %19 : vector<128x128xf32>
    %21 = vector.broadcast %4 : vector<128x1xf32> to vector<128x128xf32>
    %22 = arith.addf %20, %21 : vector<128x128xf32>
    %23 = vector.broadcast %3 : vector<128x1xf32> to vector<128x128xf32>
    %24 = arith.mulf %22, %23 : vector<128x128xf32>
    %c0_8 = arith.constant 0 : index
    %c0_9 = arith.constant 0 : index
    %25 = vector.load %arg4[%c0_8, %c0_9] : memref<128x128xf32, #tpu.memory_space<vmem>>, vector<128x128xf32>
    %cst_10 = arith.constant dense<0.000000e+00> : vector<128x128xf32>
    %26 = tpu.matmul %25, %24, %cst_10 {dimension_numbers = #tpu.dot_dimension_numbers<[1], [0], [0], [1], [0, 0, 1, 1], [], []>} : vector<128x128xf32>, vector<128x128xf32>, vector<128x128xf32> -> vector<128x128xf32>
    %27 = vector.extract_strided_slice %2 {offsets = [0, 2], sizes = [128, 1], strides = [1, 1]} : vector<128x4xf32> to vector<128x1xf32>
    %28 = vector.broadcast %27 : vector<128x1xf32> to vector<128x128xf32>
    %29 = arith.addf %26, %28 : vector<128x128xf32>
    %c0_11 = arith.constant 0 : index
    %c0_12 = arith.constant 0 : index
    %30 = vector.load %arg5[%c0_11, %c0_12] : memref<128x128xf32, #tpu.memory_space<vmem>>, vector<128x128xf32>
    %cst_13 = arith.constant dense<0.000000e+00> : vector<128x128xf32>
    %31 = tpu.matmul %30, %24, %cst_13 {dimension_numbers = #tpu.dot_dimension_numbers<[1], [0], [0], [1], [0, 0, 1, 1], [], []>} : vector<128x128xf32>, vector<128x128xf32>, vector<128x128xf32> -> vector<128x128xf32>
    %c0_14 = arith.constant 0 : index
    %c0_15 = arith.constant 0 : index
    %32 = vector.load %arg6[%c0_14, %c0_15] : memref<128x128xf32, #tpu.memory_space<vmem>>, vector<128x128xf32>
    %cst_16 = arith.constant dense<0.000000e+00> : vector<128x128xf32>
    %33 = tpu.matmul %32, %24, %cst_16 {dimension_numbers = #tpu.dot_dimension_numbers<[1], [0], [0], [1], [0, 0, 1, 1], [], []>} : vector<128x128xf32>, vector<128x128xf32>, vector<128x128xf32> -> vector<128x128xf32>
    %34 = vector.extract_strided_slice %2 {offsets = [0, 3], sizes = [128, 1], strides = [1, 1]} : vector<128x4xf32> to vector<128x1xf32>
    %35 = vector.broadcast %34 : vector<128x1xf32> to vector<128x128xf32>
    %36 = arith.addf %33, %35 : vector<128x128xf32>
    %c0_17 = arith.constant 0 : index
    %c0_18 = arith.constant 0 : index
    %c0_19 = arith.constant 0 : index
    %37 = vector.load %arg7[%c0_17, %c0_18, %c0_19] : memref<1x128x128xf32, #tpu.memory_space<vmem>>, vector<1x128x128xf32>
    %38 = vector.shape_cast %37 : vector<1x128x128xf32> to vector<128x128xf32>
    %39 = vector.shape_cast %29 : vector<128x128xf32> to vector<1x128x128xf32>
    tpu.vector_store %arg7[%c0_17, %c0_18, %c0_19], %39 {strides = array<i32>} : memref<1x128x128xf32, #tpu.memory_space<vmem>>, vector<1x128x128xf32>,
    %40 = tpu.transpose %31, [1, 0] : vector<128x128xf32> -> vector<128x128xf32>
    %c0_20 = arith.constant 0 : index
    %c0_21 = arith.constant 0 : index
    %c0_22 = arith.constant 0 : index
    %41 = vector.load %arg8[%c0_20, %c0_21, %c0_22] : memref<1x128x128xf32, #tpu.memory_space<vmem>>, vector<1x128x128xf32>
    %42 = vector.shape_cast %41 : vector<1x128x128xf32> to vector<128x128xf32>
    %43 = vector.shape_cast %40 : vector<128x128xf32> to vector<1x128x128xf32>
    tpu.vector_store %arg8[%c0_20, %c0_21, %c0_22], %43 {strides = array<i32>} : memref<1x128x128xf32, #tpu.memory_space<vmem>>, vector<1x128x128xf32>,
    %c0_23 = arith.constant 0 : index
    %c0_24 = arith.constant 0 : index
    %c0_25 = arith.constant 0 : index
    %44 = vector.load %arg9[%c0_23, %c0_24, %c0_25] : memref<1x128x128xf32, #tpu.memory_space<vmem>>, vector<1x128x128xf32>
    %45 = vector.shape_cast %44 : vector<1x128x128xf32> to vector<128x128xf32>
    %46 = vector.shape_cast %36 : vector<128x128xf32> to vector<1x128x128xf32>
    tpu.vector_store %arg9[%c0_23, %c0_24, %c0_25], %46 {strides = array<i32>} : memref<1x128x128xf32, #tpu.memory_space<vmem>>, vector<1x128x128xf32>,
    return
  }
  func.func @transform_0(%arg0: i32, %arg1: i32) -> (i32, i32, i32) {
    %c0_i32 = arith.constant 0 : i32
    %c0_i32_0 = arith.constant 0 : i32
    return %arg0, %c0_i32, %arg1 : i32, i32, i32
  }
  func.func @transform_1(%arg0: i32, %arg1: i32) -> (i32, i32) {
    %c0_i32 = arith.constant 0 : i32
    %c0_i32_0 = arith.constant 0 : i32
    %c0_i32_1 = arith.constant 0 : i32
    return %c0_i32, %c0_i32_0 : i32, i32
  }
  func.func @transform_2(%arg0: i32, %arg1: i32) -> (i32, i32) {
    %c0_i32 = arith.constant 0 : i32
    %c0_i32_0 = arith.constant 0 : i32
    %c0_i32_1 = arith.constant 0 : i32
    return %c0_i32, %c0_i32_0 : i32, i32
  }
  func.func @transform_3(%arg0: i32, %arg1: i32) -> (i32, i32) {
    %c0_i32 = arith.constant 0 : i32
    %c0_i32_0 = arith.constant 0 : i32
    %c0_i32_1 = arith.constant 0 : i32
    return %c0_i32, %c0_i32_0 : i32, i32
  }
  func.func @transform_4(%arg0: i32, %arg1: i32) -> (i32, i32) {
    %c0_i32 = arith.constant 0 : i32
    %c0_i32_0 = arith.constant 0 : i32
    %c0_i32_1 = arith.constant 0 : i32
    return %c0_i32, %c0_i32_0 : i32, i32
  }
  func.func @transform_5(%arg0: i32, %arg1: i32) -> (i32, i32, i32) {
    %c0_i32 = arith.constant 0 : i32
    %c0_i32_0 = arith.constant 0 : i32
    return %arg0, %c0_i32, %arg1 : i32, i32, i32
  }
  func.func @transform_6(%arg0: i32, %arg1: i32) -> (i32, i32, i32) {
    %c0_i32 = arith.constant 0 : i32
    %c0_i32_0 = arith.constant 0 : i32
    return %arg0, %arg1, %c0_i32 : i32, i32, i32
  }
  func.func @transform_7(%arg0: i32, %arg1: i32) -> (i32, i32, i32) {
    %c0_i32 = arith.constant 0 : i32
    %c0_i32_0 = arith.constant 0 : i32
    return %arg0, %c0_i32, %arg1 : i32, i32, i32
  }
}

</mosaic_0001>

<bundles_post_ra>
// kernel: tpu_custom_call.1
= control target key start
LH: loop header
LB: loop body
LE: loop exit
PB: predicated region body
PF: predicated region fallthrough
CT: control target
= control target key end

     0   :  { %s3410_s0 = inlined_call_operand.hbm [shape: f32[2,128,256], index: 0, kind: input, shape index: {}]   ;;  %s3411_s1 = inlined_call_operand.vmem [shape: f32[128,4], index: 1, kind: input, shape index: {}]   ;;  %s3412_s2 = inlined_call_operand.vmem [shape: f32[128,128], index: 2, kind: input, shape index: {}]   ;;  %s3413_s3 = inlined_call_operand.hbm [shape: f32[128,128], index: 3, kind: input, shape index: {}]   ;;  %s3414_s4 = inlined_call_operand.hbm [shape: f32[128,128], index: 4, kind: input, shape index: {}]   ;;  %s3415_s5 = inlined_call_operand.hbm [shape: f32[2,128,256], index: 5, kind: output, shape index: {0}]   ;;  %s3416_s6 = inlined_call_operand.hbm [shape: f32[2,256,128], index: 6, kind: output, shape index: {1}]   ;;  %s3417_s7 = inlined_call_operand.hbm [shape: f32[2,128,256], index: 7, kind: output, shape index: {2}]  }
   0x1   :  { %3435 = sst [smem:[#allocation19_spill]] %s3413_s3 }
   0x2   :  { %3436 = sst [smem:[#allocation20_spill]] %s3416_s6 }
   0x3   :  { %3437 = sst [smem:[#allocation21_spill]] %s3417_s7 }
   0x4   :  { %13 = vsyncpa [#allocation3], 0 }
   0x5   :  { %15 = vsyncpa [#allocation3 + $0x1], 0 }
   0x6   :  { %16 = vsyncpa [#allocation6], 0 }
   0x7   :  { %17 = vsyncpa [#allocation4], 0 }
   0x8   :  { %19 = vsyncpa [#allocation4 + $0x1], 0 }
   0x9   :  { %20 = vsyncpa [#allocation10], 0 }
   0xa   :  { %22 = vsyncpa [#allocation10 + $0x1], 0  ;;  %s2446_s24 = smov 0   ;;  %s2448_s25 = smov 0  }
   0xb   :  { %s2450_s26 = smov 0   ;;  %s2452_s27 = smov 0  }
   0xc   :  { %s2454_s28 = smov 0   ;;  %s2456_s29 = smov 0  }
   0xd   :  { %s2458_s30 = smov 0   ;;  %s2460_s8 = smov 0  }
   0xe LB: > { %3438 = sst [smem:[#allocation16_spill]] %s2360_s24  ;;  %s2487_s9 = sadd.s32 4294967295, %s2388_s8   ;;  %s2388_s8 = sphi %s2460_s8, %s3477_s8   ;;  %s2384_s30 = sphi %s2458_s30, %s3476_s30   ;;  %s2380_s29 = sphi %s2456_s29, %s3475_s29   ;;  %s2376_s28 = sphi %s2454_s28, %s3474_s28   ;;  %s2372_s27 = sphi %s2452_s27, %s3473_s27   ;;  %s2368_s26 = sphi %s2450_s26, %s3472_s26   ;;  %s2364_s25 = sphi %s2448_s25, %s3471_s25   ;;  %s2360_s24 = sphi %s2446_s24, %s3470_s24  }
   0xf   : > { %3439 = sst [smem:[#allocation17_spill]] %s2388_s8  ;;  %s3418_s10 = sadd.s32 4294967294, %s2388_s8  }
  0x10   : > { %p56_p0 = scmp.ne.s32.totalorder %s2368_s26, %s2364_s25  ;;  %p57_p1 = scmp.eq.s32.totalorder %s2388_s8, 0 }
  0x11   : > { %p62_p2 = scmp.ne.s32.totalorder %s2364_s25, %s2360_s24  ;;  %p3420_p3 = scmp.eq.s32.totalorder %s2487_s9, 0 }
  0x12   : > { %p172_p4 = scmp.eq.s32.totalorder %s2487_s9, 3  ;;  %p2498_p5 = por %p57_p1, %p56_p0 }
  0x13   : > { %p178_p6 = scmp.eq.s32.totalorder %s3418_s10, 3  ;;  %p2506_p7 = por %p3420_p3, %p62_p2 }
  0x14   : > { %p2510_p8 = por %p172_p4, %p56_p0  ;;  %p1595_p10 = scmp.ge.s32.totalorder %s2388_s8, 1 }
  0x15   : > { %s3441_s13 = scalar_select %p2506_p7, 1, 0 }
  0x16   : > { %s3442_s14 = scalar_select %p2510_p8, 1, 0 }
  0x17   : > { %p2514_p9 = por %p178_p6, %p62_p2  ;;  %p241_p11 = scmp.lt.s32.totalorder %s2388_s8, 5 }
  0x18   : > { %s2390_s17 = smov [#allocation5]   ;;  %p2036_p0 = scmp.lt.s32.totalorder %s2388_s8, 4 }
  0x19   : > { %s3443_s15 = scalar_select %p2514_p9, 1, 0 }
  0x1a   : > { %p2520_p12 = pnand %p1595_p10, %p241_p11  ;;  %s259_s18 = sshll.u32 %s2390_s17, 4  ;;  %s2524_s18 = int_to_ptr.vmem [resolvable:$true] %s259_s18 }
  0x1b   : > { %3444 = sst [smem:[#allocation18_spill]] %s3443_s15  ;;  %s2391_s20 = smov [#allocation7]  }
  0x1c   : > { %p2013_p13 = pneg %p2520_p12  ;;  %s272_s21 = sshll.u32 %s2391_s20, 4  ;;  %s2541_s21 = int_to_ptr.vmem [resolvable:$true] %s272_s21 }
  0x1d   : > { %p2537_p2 = pnand %p2036_p0, %p2498_p5  ;;  %s3448_s3 = sld [smem:[#allocation19_spill]] }
  0x1e   : > { %p2531_p1 = pnand %p2013_p13, %p3420_p3 }
  0x20   : > { %p2142_p6 = pneg %p2531_p1 }
  0x23   : > { %s2140_s10 = scalar_lea.hbm %s3448_s3, 2048 }
  0x24   : > { %p2141_p4 = scmp.ne.s32.totalorder %s3448_s3, %s2140_s10  ;;  %p2147_p5 = scmp.lt.u32.totalorder %s2140_s10, %s3448_s3 }
  0x26   : > { %p2143_p10 = pnand %p2142_p6, %p2141_p4 }
  0x28   : > { %p2144_p11 = pneg %p2143_p10 }
  0x2a   : > { %p2149_p13 = pnand %p2147_p5, %p2144_p11 }
  0x2c   : > { %2152 = shalt.err (!%p2149_p13)
}
  0x2d   : > { %s2153_s23 = scalar_lea.vmem %s2524_s18, 2048  ;;  %p2161_p8 = scmp.lt.s32.totalorder %s2524_s18, %s2524_s18 }
  0x2e   : > { %p2154_p0 = scmp.ne.s32.totalorder %s2524_s18, %s2153_s23  ;;  %p2162_p4 = scmp.lt.s32.totalorder %s2153_s23, %s2153_s23 }
  0x30   : > { %p2156_p3 = pnand %p2154_p0, %p2142_p6  ;;  %p2163_p10 = por %p2162_p4, %p2161_p8 }
  0x32   : > { %p2157_p9 = pneg %p2156_p3 }
  0x34   : > { %p2164_p7 = pnand %p2163_p10, %p2157_p9 }
  0x36   : > { %2167 = shalt.err (!%p2164_p7)
}
  0x37   : > { %s3428_s11 = smov 128   ;;  %s3429_s10 = smov 8  }
  0x38   : > { %2016 = dma.hbm_to_vmem [thread:$0]  (!%p2531_p1), %s3448_s3, 2048, %s2524_s18, [#allocation6], %s3428_s11, %s3428_s11, %s3429_s10  }
  0x39   : > { %s2168_s23 = scalar_lea.hbm %s3414_s4, 2048 }
  0x3a   : > { %p2169_p3 = scmp.ne.s32.totalorder %s3414_s4, %s2168_s23  ;;  %p2175_p9 = scmp.lt.u32.totalorder %s2168_s23, %s3414_s4 }
  0x3c   : > { %p2171_p7 = pnand %p2169_p3, %p2142_p6 }
  0x3e   : > { %p2172_p8 = pneg %p2171_p7 }
  0x40   : > { %p2177_p11 = pnand %p2175_p9, %p2172_p8 }
  0x42   : > { %2180 = shalt.err (!%p2177_p11)
}
  0x43   : > { %s2181_s18 = scalar_lea.vmem %s2541_s21, 2048  ;;  %p2189_p4 = scmp.lt.s32.totalorder %s2541_s21, %s2541_s21 }
  0x44   : > { %p2182_p5 = scmp.ne.s32.totalorder %s2541_s21, %s2181_s18  ;;  %p2190_p10 = scmp.lt.s32.totalorder %s2181_s18, %s2181_s18 }
  0x46   : > { %p2184_p13 = pnand %p2182_p5, %p2142_p6  ;;  %p2191_p3 = por %p2190_p10, %p2189_p4 }
  0x48   : > { %p2185_p0 = pneg %p2184_p13 }
  0x4a   : > { %p2192_p7 = pnand %p2191_p3, %p2185_p0 }
  0x4c   : > { %2195 = shalt.err (!%p2192_p7)
}
  0x4d   : > { %2019 = dma.hbm_to_vmem [thread:$0]  (!%p2531_p1), %s3414_s4, 2048, %s2541_s21, [#allocation6], %s3428_s11, %s3428_s11, %s3429_s10  }
  0x4e   : > { %s37_s24 = sadd.s32 1, %s2380_s29  ;;  %s40_s8 = sadd.s32 1, %s2384_s30 }
  0x4f   : > { %p38_p6 = scmp.ge.s32.totalorder %s37_s24, 2  ;;  %s286_s19 = sand.u32 1, %s2368_s26  }
  0x50   : > { %s1599_s15 = sshll.u32 %s286_s19, 7  ;;  %s1600_s12 = sshll.u32 %s2384_s30, 5 }
  0x51   : > { %s3479_s24 = smov (%p38_p6, %s37_s24), 0  ;;  %s3481_s8 = smov (!%p38_p6, %s40_s8), %s2384_s30 }
  0x52   : > { %s45_s17 = ssub.s32 %s2380_s29, %s3479_s24  ;;  %p42_p8 = scmp.ge.s32.totalorder %s3481_s8, 2 }
  0x53   : > { %s295_s20 = sadd.s32 %s2380_s29, %s1600_s12  ;;  %s290_s23 = scalar_lea.vmem [#allocation2], %s1599_s15 }
  0x54   : > { %s298_s18 = sshll.u32 %s290_s23, 4  ;;  %s3483_s8 = smov (%p42_p8, %s3481_s8), 0  ;;  %s2613_s18 = int_to_ptr.vmem [resolvable:$true] %s298_s18 }
  0x55   : > { %s1601_s21 = sshll.u32 %s295_s20, 7  ;;  %s44_s6 = ssub.s32 %s2384_s30, %s3483_s8 }
  0x56   : > { %s2620_s10 = scalar_lea.hbm %s3410_s0, %s1601_s21  ;;  %s2622_s3 = sor.u32 %s45_s17, %s44_s6 }
  0x57   : > { %s2625_s15 = scalar_lea.sflag [#allocation3], %s286_s19  ;;  %s2196_s12 = scalar_lea.hbm %s2620_s10, 2048 }
  0x58   : > { %p2197_p9 = scmp.ne.s32.totalorder %s2620_s10, %s2196_s12  ;;  %p2198_p11 = pneg %p2537_p2 }
  0x59   : > { %s2201_s23 = scalar_lea.hbm %s3410_s0, 8192  ;;  %p2202_p0 = scmp.lt.u32.totalorder %s2620_s10, %s3410_s0 }
  0x5a   : > { %p2199_p5 = pnand %p2198_p11, %p2197_p9  ;;  %p2203_p4 = scmp.lt.u32.totalorder %s2201_s23, %s2196_s12 }
  0x5b   : > { %p2205_p3 = scmp.lt.u32.totalorder %s2196_s12, %s2620_s10 }
  0x5c   : > { %p2200_p13 = pneg %p2199_p5  ;;  %p2204_p10 = por %p2203_p4, %p2202_p0 }
  0x5e   : > { %p2206_p7 = por %p2205_p3, %p2204_p10 }
  0x60   : > { %p2207_p6 = pnand %p2206_p7, %p2200_p13 }
  0x62   : > { %2210 = shalt.err (!%p2207_p6)
}
  0x63   : > { %s2211_s19 = scalar_lea.vmem %s2613_s18, 2048  ;;  %s2394_s17 = smov [#allocation2]  }
  0x64   : > { %p2212_p8 = scmp.ne.s32.totalorder %s2613_s18, %s2211_s19  ;;  %s2216_s6 = sshll.u32 %s2394_s17, 4  ;;  %s2217_s6 = int_to_ptr.vmem [resolvable:$false] %s2216_s6 }
  0x65   : > { %s2218_s11 = scalar_lea.vmem %s2217_s6, 4096  ;;  %p2219_p1 = scmp.lt.s32.totalorder %s2613_s18, %s2217_s6 }
  0x66   : > { %p2214_p9 = pnand %p2212_p8, %p2198_p11  ;;  %p2220_p0 = scmp.lt.s32.totalorder %s2218_s11, %s2211_s19 }
  0x68   : > { %p2215_p5 = pneg %p2214_p9  ;;  %p2221_p4 = por %p2220_p0, %p2219_p1 }
  0x6a   : > { %p2222_p10 = pnand %p2221_p4, %p2215_p5 }
  0x6c   : > { %2225 = shalt.err (!%p2222_p10)
}
  0x6d   : > { %s2395_s12 = smov 256   ;;  %s3449_s20 = smov 8  }
  0x6e   : > { %s3450_s23 = smov 128   ;;  %s3451_s21 = sadd.s32 1, %s2368_s26 }
  0x6f   : > { %2023 = dma.hbm_to_vmem [thread:$0]  (!%p2537_p2), %s2620_s10, 2048, %s2613_s18, %s2625_s15, %s2395_s12, %s3450_s23, %s3449_s20  }
  0x70   : > { %p3452_p11 = scmp.eq.s32.totalorder %s2622_s3, 0  ;;  %310 = sbr.rel (%p2520_p12) target bundleno = 787 (0x313), region = 40 }
  0x71   : > { %s2665_s19 = sand.u32 (!%p2520_p12), 1, %s2364_s25   ;;  %p3453_p2 = scmp.ne.s32.totalorder (!%p2520_p12), %s3441_s13, 0 }
  0x72   : > { %s2660_s7 = scalar_select %p3452_p11, %s2368_s26, %s3451_s21  }
  0x73   : > { %s2668_s22 = sshll.u32 (!%p2520_p12), %s2665_s19, 7  ;;  %s313_s17 = scalar_lea.sflag (!%p2520_p12), [#allocation3], %s2665_s19 }
  0x74   : > { %s2672_s6 = scalar_lea.vmem (!%p2520_p12), [#allocation2], %s2668_s22 }
  0x77   : > { %2343 = dma.done.wait (%p3453_p2), %s313_s17, 2048  }
  0x78   : > { %2345 = vsyncadd (%p3453_p2), %s313_s17, 4294965248  ;;  %p3454_p1 = scmp.eq.s32.totalorder %s2487_s9, 0 }
  0x7a   : > { %2347 = dma.done.wait (%p3454_p1), [#allocation6], 4096   ;;  %p3455_p12 = pmov %p3454_p1 }
  0x7b   : > { %v2396_v0 = vmov 0   ;;  %v2687_v1 = vld [vmem:[%s3411_s1 + $0x10] sm:$0xff]  ;;  %v2692_v2 = vld [vmem:[%s3411_s1] sm:$0xff]  ;;  %v2704_v4 = vld [vmem:[%s3411_s1 + $0x8] sm:$0xff]  ;;  %v2397_v13 = vmov 1   ;;  %s3167_s3 = scalar_lea.vmem [#allocation8], %s2668_s22 }
  0x7c   : > { %2349 = vsyncadd (%p3455_p12), [#allocation6], 4294963200  ;;  %2118 = vset.pattern.permute.xlu0 %v2396_v0  ;;  %2116 = vset.pattern.permute.xlu1 %v2396_v0  ;;  %v2699_v3 = vld [vmem:[%s3411_s1 + $0x30] sm:$0xff]  ;;  %v2709_v5 = vld [vmem:[%s2672_s6] sm:$0xff]  ;;  %s3214_s16 = scalar_lea.vmem [#allocation11], %s2668_s22  ;;  %s3430_s13 = sshll.u32 %s2376_s28, 5 }
  0x7d   : > { %598 = vperm.xlu0 %2118, %v2687_v1   ;;  %590 = vperm.xlu1 %2116, %v2692_v2   ;;  %v2712_v6 = vld [vmem:[%s2672_s6 + $0x8] sm:$0xff]  ;;  %v2717_v7 = vld [vmem:[%s3411_s1 + $0x50] sm:$0xff]  ;;  %v2727_v10 = vld [vmem:[%s3411_s1 + $0x18] sm:$0xff]  ;;  %s3247_s10 = sadd.s32 %s2372_s27, %s3430_s13  ;;  %p3456_p3 = scmp.ne.s32.totalorder %s3442_s14, 0 }
  0x7e   : > { %v2720_v8 = vld [vmem:[%s2672_s6 + $0x10] sm:$0xff]  ;;  %v398_v9 = vadd.f32 %v2712_v6, %v2709_v5  ;;  %v2730_v11 = vld [vmem:[%s2672_s6 + $0x18] sm:$0xff]  ;;  %v2736_v14 = vld [vmem:[%s2672_s6 + $0x20] sm:$0xff]  ;;  %s3431_s18 = sshll.u32 %s3247_s10, 7  ;;  %s2400_s21 = smov [#allocation8]  }
  0x7f   : > { %v2741_v16 = vld [vmem:[%s2672_s6 + $0x28] sm:$0xff]  ;;  %v2746_v18 = vld [vmem:[%s2672_s6 + $0x30] sm:$0xff]  ;;  %v2753_v20 = vld [vmem:[%s2672_s6 + $0x38] sm:$0xff]  ;;  %s3255_s12 = scalar_lea.hbm %s3415_s5, %s3431_s18  ;;  %s2230_s17 = sshll.u32 %s2400_s21, 4  ;;  %s2231_s17 = int_to_ptr.vmem [resolvable:$false] %s2230_s17 }
  0x80   : > { %v399_v12 = vadd.f32 %v398_v9, %v2720_v8  ;;  %v2759_v22 = vld [vmem:[%s3411_s1 + $0x20] sm:$0xff]  ;;  %v2768_v25 = vld [vmem:[%s2672_s6 + $0x48] sm:$0xff]  ;;  %v2773_v27 = vld [vmem:[%s2672_s6 + $0x50] sm:$0xff]  ;;  %s2232_s13 = scalar_lea.vmem %s2231_s17, 4096 }
  0x81   : > { %614 = vperm.xlu0 %2118, %v2699_v3   ;;  %594 = vperm.xlu1 %2116, %v2704_v4   ;;  %v2762_v23 = vld [vmem:[%s2672_s6 + $0x40] sm:$0xff]  ;;  %v2780_v29 = vld [vmem:[%s3411_s1 + $0x28] sm:$0xff]  ;;  %v2783_v30 = vld [vmem:[%s2672_s6 + $0x58] sm:$0xff] }
  0x82   : > { %v400_v15 = vadd.f32 %v399_v12, %v2730_v11  ;;  %v2789_v32 = vld [vmem:[%s2672_s6 + $0x60] sm:$0xff]  ;;  %v2794_v34 = vld [vmem:[%s2672_s6 + $0x68] sm:$0xff]  ;;  %v2799_v36 = vld [vmem:[%s2672_s6 + $0x70] sm:$0xff] }
  0x83   : > { %v2806_v38 = vld [vmem:[%s3411_s1 + $0x48] sm:$0xff]  ;;  %v2811_v39 = vld [vmem:[%s3411_s1 + $0x38] sm:$0xff]  ;;  %v2832_v47 = vld [vmem:[%s3411_s1 + $0x40] sm:$0xff] }
  0x84   : > { %v401_v17 = vadd.f32 %v400_v15, %v2736_v14  ;;  %v2814_v40 = vld [vmem:[%s2672_s6 + $0x78] sm:$0xff]  ;;  %v2827_v45 = vld [vmem:[%s3411_s1 + $0x68] sm:$0xff]  ;;  %v2839_v49 = vld [vmem:[%s3411_s1 + $0x70] sm:$0xff]  ;;  %s1385_s6 = sshll.u32 %s3167_s3, 4  ;;  %s3258_s6 = int_to_ptr.vmem [resolvable:$true] %s1385_s6 }
  0x85   : > { %630 = vperm.xlu0 %2118, %v2717_v7   ;;  %2117 = vset.pattern.permute.xlu1 %v2397_v13  ;;  %v2867_v59 = vld [vmem:[%s3411_s1 + $0x58] sm:$0xff]  ;;  %s2226_s23 = scalar_lea.vmem %s3258_s6, 2048  ;;  %p2233_p8 = scmp.lt.s32.totalorder %s3258_s6, %s2231_s17 }
  0x86   : > { %510 = vperm.xlu1 %2117, %v2727_v10   ;;  %v402_v19 = vadd.f32 %v401_v17, %v2741_v16  ;;  %p2227_p13 = scmp.ne.s32.totalorder %s3258_s6, %s2226_s23  ;;  %p2234_p9 = scmp.lt.s32.totalorder %s2232_s13, %s2226_s23 }
  0x88   : > { %v403_v21 = vadd.f32 %v402_v19, %v2746_v18  ;;  %p2228_p7 = pnand %p2227_p13, %p3456_p3  ;;  %p2235_p5 = por %p2234_p9, %p2233_p8 }
  0x89   : > { %2127 = vset.pattern.permute.xlu0 %v2397_v13 }
  0x8a   : > { %495 = vperm.xlu0 %2127, %v2692_v2   ;;  %2119 = vset.pattern.permute.xlu1 %v2396_v0  ;;  %v404_v24 = vadd.f32 %v403_v21, %v2753_v20  ;;  %p2229_p6 = pneg %p2228_p7 }
  0x8b   : > { %602 = vperm.xlu1 %2119, %v2727_v10  }
  0x8c   : > { %v405_v26 = vadd.f32 %v404_v24, %v2762_v23  ;;  %p2236_p0 = pnand %p2235_p5, %p2229_p6 }
  0x8e   : > { %500 = vperm.xlu0 %2127, %v2704_v4   ;;  %v406_v28 = vadd.f32 %v405_v26, %v2768_v25 }
  0x8f   : > { %2120 = vset.pattern.permute.xlu1 %v2397_v13 }
  0x90   : > { %515 = vperm.xlu1 %2120, %v2759_v22   ;;  %v407_v31 = vadd.f32 %v406_v28, %v2773_v27 }
  0x92   : > { %505 = vperm.xlu0 %2127, %v2687_v1   ;;  %v408_v33 = vadd.f32 %v407_v31, %v2783_v30 }
  0x94   : > { %2121 = vset.pattern.permute.xlu1 %v2396_v0  ;;  %v409_v35 = vadd.f32 %v408_v33, %v2789_v32 }
  0x95   : > { %606 = vperm.xlu1 %2121, %v2759_v22  }
  0x96   : > { %520 = vperm.xlu0 %2127, %v2780_v29   ;;  %v410_v37 = vadd.f32 %v409_v35, %v2794_v34 }
  0x98   : > { %v411_v41 = vadd.f32 %v410_v37, %v2799_v36 }
  0x99   : > { %610 = vperm.xlu1 %2121, %v2780_v29  }
  0x9a   : > { %525 = vperm.xlu0 %2127, %v2699_v3   ;;  %v412_v42 = vadd.f32 %v411_v41, %v2814_v40 }
  0x9c   : > { %v413_v43 = vrot.slane %v412_v42, 4 }
  0x9d   : > { %2122 = vset.pattern.permute.xlu1 %v2397_v13 }
  0x9e   : > { %540 = vperm.xlu0 %2127, %v2806_v38   ;;  %530 = vperm.xlu1 %2122, %v2811_v39   ;;  %v414_v44 = vadd.f32 %v413_v43, %v412_v42 }
  0xa0   : > { %v415_v46 = vrot.slane %v414_v44, 2 }
  0xa2   : > { %545 = vperm.xlu0 %2127, %v2717_v7   ;;  %2123 = vset.pattern.permute.xlu1 %v2396_v0  ;;  %v416_v48 = vadd.f32 %v415_v46, %v414_v44 }
  0xa3   : > { %618 = vperm.xlu1 %2123, %v2811_v39  }
  0xa4   : > { %v417_v50 = vrot.slane %v416_v48, 1 }
  0xa6   : > { %560 = vperm.xlu0 %2127, %v2827_v45   ;;  %v418_v51 = vadd.f32 %v417_v50, %v416_v48  ;;  %v2934_v50 = vld [vmem:[%s3411_s1 + $0x78] sm:$0xff] }
  0xa7   : > { %2124 = vset.pattern.permute.xlu1 %v2397_v13 }
  0xa8   : > { %535 = vperm.xlu1 %2124, %v2832_v47   ;;  %v420_v52 = vmul.f32 0.0078125, %v418_v51 }
  0xaa   : > { %565 = vperm.xlu0 %2127, %v2839_v49   ;;  %v2847_v53 = vsub.f32 %v2709_v5, %v420_v52  ;;  %v2850_v54 = vsub.f32 %v2712_v6, %v420_v52  ;;  %v2854_v55 = vsub.f32 %v2720_v8, %v420_v52  ;;  %v2858_v56 = vsub.f32 %v2730_v11, %v420_v52 }
  0xab   : > { %v2870_v60 = vsub.f32 %v2736_v14, %v420_v52  ;;  %v2877_v62 = vsub.f32 %v2741_v16, %v420_v52  ;;  %v2882_v6 = vsub.f32 %v2746_v18, %v420_v52  ;;  %v2888_v11 = vsub.f32 %v2753_v20, %v420_v52  ;;  %v2901_v18 = vld [vmem:[%s3411_s1 + $0x60] sm:$0xff] }
  0xac   : > { %2125 = vset.pattern.permute.xlu1 %v2396_v0  ;;  %v437_v57 = vmul.f32 %v2847_v53, %v2847_v53  ;;  %v438_v58 = vmul.f32 %v2850_v54, %v2850_v54  ;;  %v439_v61 = vmul.f32 %v2854_v55, %v2854_v55  ;;  %v440_v63 = vmul.f32 %v2858_v56, %v2858_v56 }
  0xad   : > { %622 = vperm.xlu1 %2125, %v2832_v47   ;;  %v441_v8 = vmul.f32 %v2870_v60, %v2870_v60  ;;  %v442_v12 = vmul.f32 %v2877_v62, %v2877_v62  ;;  %v2894_v15 = vsub.f32 %v2762_v23, %v420_v52  ;;  %v443_v16 = vmul.f32 %v2882_v6, %v2882_v6 }
  0xae   : > { %2132 = vset.pattern.permute.xlu0 %v2396_v0  ;;  %v453_v5 = vadd.f32 %v438_v58, %v437_v57  ;;  %v2904_v19 = vsub.f32 %v2768_v25, %v420_v52  ;;  %v444_v20 = vmul.f32 %v2888_v11, %v2888_v11  ;;  %v2911_v23 = vsub.f32 %v2773_v27, %v420_v52 }
  0xaf   : > { %646 = vperm.xlu0 %2132, %v2839_v49   ;;  %v445_v24 = vmul.f32 %v2894_v15, %v2894_v15  ;;  %v2916_v28 = vsub.f32 %v2783_v30, %v420_v52  ;;  %v433_v33 = vsub.f32 %v2789_v32, %v420_v52  ;;  %v434_v37 = vsub.f32 %v2794_v34, %v420_v52 }
  0xb0   : > { %v454_v9 = vadd.f32 %v453_v5, %v439_v61  ;;  %v446_v25 = vmul.f32 %v2904_v19, %v2904_v19  ;;  %v447_v35 = vmul.f32 %v2911_v23, %v2911_v23  ;;  %v435_v42 = vsub.f32 %v2799_v36, %v420_v52  ;;  %v669_v5 = vld [vmem:[%s3412_s2] sm:$0xff] }
  0xb1   : > { %626 = vperm.xlu1 %2125, %v2806_v38   ;;  %v448_v30 = vmul.f32 %v2916_v28, %v2916_v28  ;;  %v449_v43 = vmul.f32 %v433_v33, %v433_v33  ;;  %v436_v32 = vsub.f32 %v2814_v40, %v420_v52  ;;  %v450_v46 = vmul.f32 %v434_v37, %v434_v37 }
  0xb2   : > { %v455_v14 = vadd.f32 %v454_v9, %v440_v63  ;;  %v451_v34 = vmul.f32 %v435_v42, %v435_v42  ;;  %1749 = vmatprep.mubr.f32.mxu0 %v669_v5 }
  0xb3   : > { %v452_v36 = vmul.f32 %v436_v32, %v436_v32 }
  0xb4   : > { %v456_v17 = vadd.f32 %v455_v14, %v441_v8  ;;  %v894_v8 = vld [vmem:[#allocation5] sm:$0xff] }
  0xb5   : > { %2126 = vset.pattern.permute.xlu1 %v2397_v13  ;;  %1805 = vmatprep.mubr.f32.mxu1 %v894_v8 }
  0xb6   : > { %550 = vperm.xlu1 %2126, %v2867_v59   ;;  %v457_v21 = vadd.f32 %v456_v17, %v442_v12 }
  0xb8   : > { %v458_v26 = vadd.f32 %v457_v21, %v443_v16 }
  0xba   : > { %2128 = vset.pattern.permute.xlu1 %v2396_v0  ;;  %v459_v31 = vadd.f32 %v458_v26, %v444_v20 }
  0xbb   : > { %634 = vperm.xlu1 %2128, %v2867_v59  }
  0xbc   : > { %v460_v27 = vadd.f32 %v459_v31, %v445_v24 }
  0xbe   : > { %v461_v41 = vadd.f32 %v460_v27, %v446_v25 }
  0xbf   : > { %2129 = vset.pattern.permute.xlu1 %v2397_v13 }
  0xc0   : > { %555 = vperm.xlu1 %2129, %v2901_v18   ;;  %v462_v44 = vadd.f32 %v461_v41, %v447_v35  ;;  %v2398_v41 = vmov 2  }
  0xc1   : > { %2135 = vset.pattern.permute.xlu0 %v2398_v41 }
  0xc2   : > { %v463_v48 = vadd.f32 %v462_v44, %v448_v30  ;;  %690 = vperm.xlu0 %2135, %v2704_v4  }
  0xc4   : > { %2130 = vset.pattern.permute.xlu1 %v2396_v0  ;;  %v464_v51 = vadd.f32 %v463_v48, %v449_v43 }
  0xc5   : > { %638 = vperm.xlu1 %2130, %v2901_v18  }
  0xc6   : > { %v465_v57 = vadd.f32 %v464_v51, %v450_v46  ;;  %702 = vperm.xlu0 %2135, %v2759_v22  }
  0xc8   : > { %v466_v58 = vadd.f32 %v465_v57, %v451_v34 }
  0xc9   : > { %642 = vperm.xlu1 %2130, %v2827_v45  }
  0xca   : > { %v467_v61 = vadd.f32 %v466_v58, %v452_v36  ;;  %710 = vperm.xlu0 %2135, %v2699_v3  }
  0xcc   : > { %v468_v40 = vrot.slane %v467_v61, 4 }
  0xcd   : > { %2131 = vset.pattern.permute.xlu1 %v2397_v13 }
  0xce   : > { %570 = vperm.xlu1 %2131, %v2934_v50   ;;  %v469_v52 = vadd.f32 %v468_v40, %v467_v61  ;;  %718 = vperm.xlu0 %2135, %v2832_v47  }
  0xd0   : > { %v470_v63 = vrot.slane %v469_v52, 2 }
  0xd2   : > { %2133 = vset.pattern.permute.xlu1 %v2396_v0  ;;  %v471_v9 = vadd.f32 %v470_v63, %v469_v52  ;;  %726 = vperm.xlu0 %2135, %v2717_v7  }
  0xd3   : > { %650 = vperm.xlu1 %2133, %v2934_v50  }
  0xd4   : > { %v472_v13 = vrot.slane %v471_v9, 1 }
  0xd6   : > { %v473_v12 = vadd.f32 %v472_v13, %v471_v9  ;;  %734 = vperm.xlu0 %2135, %v2901_v18  }
  0xd7   : > { %2134 = vset.pattern.permute.xlu1 %v2398_v41 }
  0xd8   : > { %v474_v14 = vmul.f32 0.0078125, %v473_v12  ;;  %686 = vperm.xlu1 %2134, %v2692_v2  }
  0xda   : > { %v475_v16 = vadd.f32 1e-05, %v474_v14  ;;  %742 = vperm.xlu0 %2135, %v2839_v49  }
  0xdc   : > { %2138 = vrsqrt.f32 %v475_v16  ;;  %694 = vperm.xlu1 %2134, %v2687_v1  }
  0xe0   : > { %698 = vperm.xlu1 %2134, %v2727_v10  }
  0xe4   : > { %706 = vperm.xlu1 %2134, %v2780_v29  }
  0xe6   : > { %v2943_v0 = vpop.eup %2138 }
  0xe7   : > { %v2946_v17 = vmul.f32 %v2943_v0, %v434_v37  ;;  %v2949_v20 = vmul.f32 %v2943_v0, %v435_v42  ;;  %v2952_v21 = vmul.f32 %v2943_v0, %v433_v33  ;;  %v2955_v24 = vmul.f32 %v2943_v0, %v436_v32 }
  0xe8   : > { %v477_v37 = vmul.f32 %v2943_v0, %v2847_v53  ;;  %v478_v43 = vmul.f32 %v2943_v0, %v2850_v54  ;;  %v480_v53 = vmul.f32 %v2943_v0, %v2858_v56  ;;  %v479_v48 = vmul.f32 %v2943_v0, %v2854_v55  ;;  %714 = vperm.xlu1 %2134, %v2811_v39  }
  0xe9   : > { %v482_v40 = vmul.f32 %v2943_v0, %v2877_v62  ;;  %v481_v56 = vmul.f32 %v2943_v0, %v2870_v60  ;;  %v483_v16 = vmul.f32 %v2943_v0, %v2882_v6 }
  0xec   : > { %722 = vperm.xlu1 %2134, %v2806_v38  }
  0xf0   : > { %730 = vperm.xlu1 %2134, %v2867_v59  }
  0xf4   : > { %738 = vperm.xlu1 %2134, %v2827_v45  }
  0xf8   : > { %746 = vperm.xlu1 %2134, %v2934_v50  }
  0xfc   : > { %v591_v26 = vpop.permute.xlu1 %590  ;;  %v599_v25 = vpop.permute.xlu0 %598 }
 0x100   : > { %v595_v31 = vpop.permute.xlu1 %594  ;;  %v2957_v35 = vpop.permute.xlu0 %614 }
 0x104   : > { %v2959_v27 = vpop.permute.xlu0 %630 }
 0x105   : > { %v511_v30 = vpop.permute.xlu1 %510 }
 0x106   : > { %v576_v54 = vadd.f32 %v511_v30, %v480_v53 }
 0x109   : > { %v496_v42 = vpop.permute.xlu0 %495 }
 0x10a   : > { %v603_v33 = vpop.permute.xlu1 %602  ;;  %v573_v44 = vadd.f32 %v496_v42, %v477_v37 }
 0x10b   : > { %v656_v52 = vmul.f32 %v603_v33, %v576_v54  ;;  %v488_v54 = vmul.f32 %v2943_v0, %v2916_v28 }
 0x10c   : > { %v653_v51 = vmul.f32 %v591_v26, %v573_v44  ;;  %v485_v44 = vmul.f32 %v2943_v0, %v2894_v15 }
 0x10d   : > { %v501_v32 = vpop.permute.xlu0 %500 }
 0x10e   : > { %v574_v46 = vadd.f32 %v501_v32, %v478_v43  ;;  %v486_v43 = vmul.f32 %v2943_v0, %v2904_v19 }
 0x10f   : > { %v516_v34 = vpop.permute.xlu1 %515 }
 0x110   : > { %v654_v36 = vmul.f32 %v595_v31, %v574_v46  ;;  %v577_v60 = vadd.f32 %v516_v34, %v481_v56 }
 0x111   : > { %v506_v57 = vpop.permute.xlu0 %505 }
 0x112   : > { %v2975_v58 = vpack.c.bf16 %v654_v36, %v653_v51  ;;  %v575_v61 = vadd.f32 %v506_v57, %v479_v48 }
 0x114   : > { %v655_v55 = vmul.f32 %v599_v25, %v575_v61  ;;  %v607_v63 = vpop.permute.xlu1 %606  ;;  %1886 = vmatprep.subr.bf16.mxu0 %v2975_v58  ;;  %1918 = vmatprep.subr.bf16.mxu1 %v2975_v58  ;;  %v484_v25 = vmul.f32 %v2943_v0, %v2888_v11 }
 0x115   : > { %v521_v5 = vpop.permute.xlu0 %520  ;;  %1888 = vmatpush3.bf16.msra.mxu0 %v2975_v58  ;;  %1920 = vmatpush3.bf16.msra.mxu1 %v2975_v58  ;;  %v657_v13 = vmul.f32 %v607_v63, %v577_v60  ;;  %v672_v63 = vld [vmem:[%s3412_s2 + $0x18] sm:$0xff]  ;;  %v898_v60 = vld [vmem:[#allocation5 + $0x20] sm:$0xff] }
 0x116   : > { %v2985_v8 = vpack.c.bf16 %v656_v52, %v655_v55  ;;  %v578_v9 = vadd.f32 %v521_v5, %v482_v40  ;;  %v897_v5 = vld [vmem:[#allocation5 + $0x18] sm:$0xff] }
 0x118   : > { %v611_v62 = vpop.permute.xlu1 %610  ;;  %1890 = vmatprep.subr.bf16.mxu0 %v2985_v8  ;;  %1922 = vmatprep.subr.bf16.mxu1 %v2985_v8 }
 0x119   : > { %v658_v12 = vmul.f32 %v611_v62, %v578_v9  ;;  %1892 = vmatpush3.bf16.msra.mxu0 %v2985_v8  ;;  %1924 = vmatpush3.bf16.msra.mxu1 %v2985_v8  ;;  %v526_v31 = vpop.permute.xlu0 %525  ;;  %v673_v9 = vld [vmem:[%s3412_s2 + $0x20] sm:$0xff]  ;;  %v899_v62 = vld [vmem:[#allocation5 + $0x28] sm:$0xff] }
 0x11a   : > { %v579_v30 = vadd.f32 %v526_v31, %v483_v16  ;;  %v901_v16 = vld [vmem:[#allocation5 + $0x38] sm:$0xff]  ;;  %v903_v31 = vld [vmem:[#allocation5 + $0x48] sm:$0xff] }
 0x11b   : > { %v2995_v14 = vpack.c.bf16 %v658_v12, %v657_v13  ;;  %v675_v13 = vld [vmem:[%s3412_s2 + $0x30] sm:$0xff] }
 0x11c   : > { %v659_v41 = vmul.f32 %v2957_v35, %v579_v30  ;;  %v2399_v35 = vmov 3   ;;  %v900_v12 = vld [vmem:[#allocation5 + $0x30] sm:$0xff] }
 0x11d   : > { %v531_v26 = vpop.permute.xlu1 %530  ;;  %1894 = vmatprep.subr.bf16.mxu0 %v2995_v14  ;;  %1926 = vmatprep.subr.bf16.mxu1 %v2995_v14  ;;  %v541_v32 = vpop.permute.xlu0 %540  ;;  %v679_v30 = vld [vmem:[%s3412_s2 + $0x50] sm:$0xff] }
 0x11e   : > { %1896 = vmatpush3.bf16.msra.mxu0 %v2995_v14  ;;  %1928 = vmatpush3.bf16.msra.mxu1 %v2995_v14  ;;  %v580_v37 = vadd.f32 %v531_v26, %v484_v25  ;;  %v582_v46 = vadd.f32 %v541_v32, %v486_v43  ;;  %v677_v26 = vld [vmem:[%s3412_s2 + $0x40] sm:$0xff]  ;;  %v907_v43 = vld [vmem:[#allocation5 + $0x68] sm:$0xff]  ;;  %v684_v32 = vld [vmem:[%s3412_s2 + $0x78] sm:$0xff] }
 0x11f   : > { %2136 = vset.pattern.permute.xlu0 %v2399_v35  ;;  %2137 = vset.pattern.permute.xlu1 %v2399_v35  ;;  %v902_v25 = vld [vmem:[#allocation5 + $0x40] sm:$0xff]  ;;  %v683_v35 = vld [vmem:[%s3412_s2 + $0x70] sm:$0xff] }
 0x120   : > { %1072 = vperm.xlu0 %2136, %v2692_v2   ;;  %1076 = vperm.xlu1 %2137, %v2704_v4   ;;  %v487_v2 = vmul.f32 %v2943_v0, %v2911_v23 }
 0x121   : > { %v546_v36 = vpop.permute.xlu0 %545 }
 0x122   : > { %v619_v6 = vpop.permute.xlu1 %618  ;;  %v583_v4 = vadd.f32 %v546_v36, %v487_v2  ;;  %v1065_v2 = vld [vmem:[#allocation7 + $0x50] sm:$0xff]  ;;  %v1066_v36 = vld [vmem:[#allocation7 + $0x58] sm:$0xff] }
 0x123   : > { %v660_v42 = vmul.f32 %v619_v6, %v580_v37  ;;  %v904_v37 = vld [vmem:[#allocation5 + $0x50] sm:$0xff]  ;;  %v680_v6 = vld [vmem:[%s3412_s2 + $0x58] sm:$0xff] }
 0x124   : > { %1084 = vperm.xlu0 %2136, %v2727_v10   ;;  %1080 = vperm.xlu1 %2137, %v2687_v1   ;;  %v663_v23 = vmul.f32 %v2959_v27, %v583_v4  ;;  %v1060_v4 = vld [vmem:[#allocation7 + $0x28] sm:$0xff] }
 0x125   : > { %v3010_v11 = vpack.c.bf16 %v660_v42, %v659_v41  ;;  %v561_v1 = vpop.permute.xlu0 %560  ;;  %v905_v41 = vld [vmem:[#allocation5 + $0x58] sm:$0xff]  ;;  %v681_v42 = vld [vmem:[%s3412_s2 + $0x60] sm:$0xff] }
 0x127   : > { %v536_v33 = vpop.permute.xlu1 %535  ;;  %1898 = vmatprep.subr.bf16.mxu0 %v3010_v11  ;;  %1930 = vmatprep.subr.bf16.mxu1 %v3010_v11 }
 0x128   : > { %1900 = vmatpush3.bf16.msra.mxu0 %v3010_v11  ;;  %1932 = vmatpush3.bf16.msra.mxu1 %v3010_v11  ;;  %v581_v48 = vadd.f32 %v536_v33, %v485_v44  ;;  %v682_v33 = vld [vmem:[%s3412_s2 + $0x68] sm:$0xff]  ;;  %v908_v44 = vld [vmem:[#allocation5 + $0x70] sm:$0xff] }
 0x129   : > { %1092 = vperm.xlu0 %2136, %v2780_v29   ;;  %1088 = vperm.xlu1 %2137, %v2759_v22   ;;  %v586_v22 = vadd.f32 %v561_v1, %v2946_v17 }
 0x12c   : > { %v623_v53 = vpop.permute.xlu1 %622 }
 0x12d   : > { %v661_v51 = vmul.f32 %v623_v53, %v581_v48  ;;  %1100 = vperm.xlu0 %2136, %v2811_v39   ;;  %1096 = vperm.xlu1 %2137, %v2699_v3   ;;  %v566_v3 = vpop.permute.xlu0 %565  ;;  %v909_v53 = vld [vmem:[#allocation5 + $0x78] sm:$0xff]  ;;  %v1063_v48 = vld [vmem:[#allocation7 + $0x40] sm:$0xff] }
 0x130   : > { %v627_v34 = vpop.permute.xlu1 %626 }
 0x131   : > { %v662_v19 = vmul.f32 %v627_v34, %v582_v46  ;;  %1108 = vperm.xlu0 %2136, %v2806_v38   ;;  %1104 = vperm.xlu1 %2137, %v2832_v47   ;;  %v647_v47 = vpop.permute.xlu0 %646  ;;  %v1055_v46 = vld [vmem:[#allocation7] sm:$0xff]  ;;  %v1056_v34 = vld [vmem:[#allocation7 + $0x8] sm:$0xff] }
 0x133   : > { %v3028_v15 = vpack.c.bf16 %v662_v19, %v661_v51  ;;  %v1064_v51 = vld [vmem:[#allocation7 + $0x48] sm:$0xff]  ;;  %v1057_v19 = vld [vmem:[#allocation7 + $0x10] sm:$0xff] }
 0x135   : > { %v551_v57 = vpop.permute.xlu1 %550  ;;  %1902 = vmatprep.subr.bf16.mxu0 %v3028_v15  ;;  %1934 = vmatprep.subr.bf16.mxu1 %v3028_v15 }
 0x136   : > { %1904 = vmatpush3.bf16.msra.mxu0 %v3028_v15  ;;  %1936 = vmatpush3.bf16.msra.mxu1 %v3028_v15  ;;  %v584_v10 = vadd.f32 %v551_v57, %v488_v54  ;;  %v1059_v57 = vld [vmem:[#allocation7 + $0x20] sm:$0xff] }
 0x137   : > { %1116 = vperm.xlu0 %2136, %v2867_v59   ;;  %1112 = vperm.xlu1 %2137, %v2717_v7   ;;  %v1067_v54 = vld [vmem:[#allocation7 + $0x60] sm:$0xff] }
 0x13a   : > { %v635_v29 = vpop.permute.xlu1 %634 }
 0x13b   : > { %v664_v61 = vmul.f32 %v635_v29, %v584_v10  ;;  %1124 = vperm.xlu0 %2136, %v2827_v45   ;;  %v587_v45 = vadd.f32 %v566_v3, %v2949_v20  ;;  %1120 = vperm.xlu1 %2137, %v2901_v18   ;;  %v670_v18 = vld [vmem:[%s3412_s2 + $0x8] sm:$0xff]  ;;  %v1061_v29 = vld [vmem:[#allocation7 + $0x30] sm:$0xff] }
 0x13c   : > { %v895_v20 = vld [vmem:[#allocation5 + $0x8] sm:$0xff] }
 0x13d   : > { %v3041_v28 = vpack.c.bf16 %v664_v61, %v663_v23  ;;  %v667_v17 = vmul.f32 %v647_v47, %v587_v45  ;;  %v1068_v10 = vld [vmem:[#allocation7 + $0x68] sm:$0xff]  ;;  %v1069_v23 = vld [vmem:[#allocation7 + $0x70] sm:$0xff]  ;;  %v1062_v61 = vld [vmem:[#allocation7 + $0x38] sm:$0xff] }
 0x13f   : > { %v556_v0 = vpop.permute.xlu1 %555  ;;  %1906 = vmatprep.subr.bf16.mxu0 %v3041_v28  ;;  %1938 = vmatprep.subr.bf16.mxu1 %v3041_v28 }
 0x140   : > { %1908 = vmatpush3.bf16.msra.mxu0 %v3041_v28  ;;  %1940 = vmatpush3.bf16.msra.mxu1 %v3041_v28  ;;  %v585_v38 = vadd.f32 %v556_v0, %v2952_v21 }
 0x141   : > { %1132 = vperm.xlu0 %2136, %v2934_v50   ;;  %1128 = vperm.xlu1 %2137, %v2839_v49   ;;  %v671_v49 = vld [vmem:[%s3412_s2 + $0x10] sm:$0xff] }
 0x144   : > { %v639_v39 = vpop.permute.xlu1 %638 }
 0x145   : > { %v665_v40 = vmul.f32 %v639_v39, %v585_v38  ;;  %v691_v38 = vpop.permute.xlu0 %690 }
 0x148   : > { %v643_v27 = vpop.permute.xlu1 %642 }
 0x149   : > { %v666_v56 = vmul.f32 %v643_v27, %v586_v22 }
 0x14b   : > { %v3055_v52 = vpack.c.bf16 %v666_v56, %v665_v40  ;;  %v703_v40 = vpop.permute.xlu0 %702 }
 0x14d   : > { %v571_v59 = vpop.permute.xlu1 %570  ;;  %1910 = vmatprep.subr.bf16.mxu0 %v3055_v52  ;;  %1942 = vmatprep.subr.bf16.mxu1 %v3055_v52 }
 0x14e   : > { %1912 = vmatpush3.bf16.msra.mxu0 %v3055_v52  ;;  %1944 = vmatpush3.bf16.msra.mxu1 %v3055_v52  ;;  %v588_v7 = vadd.f32 %v571_v59, %v2955_v24  ;;  %v896_v24 = vld [vmem:[#allocation5 + $0x10] sm:$0xff] }
 0x14f   : > { %v711_v3 = vpop.permute.xlu0 %710 }
 0x152   : > { %v651_v50 = vpop.permute.xlu1 %650 }
 0x153   : > { %v668_v21 = vmul.f32 %v651_v50, %v588_v7  ;;  %v719_v59 = vpop.permute.xlu0 %718 }
 0x155   : > { %v3065_v55 = vpack.c.bf16 %v668_v21, %v667_v17 }
 0x157   : > { %1914 = vmatprep.subr.bf16.mxu0 %v3065_v55  ;;  %1946 = vmatprep.subr.bf16.mxu1 %v3065_v55  ;;  %v687_v0 = vpop.permute.xlu1 %686  ;;  %v3152_v47 = vpop.permute.xlu0 %726 }
 0x158   : > { %1916 = vmatpush3.bf16.msra.mxu0 %v3065_v55  ;;  %1948 = vmatpush3.bf16.msra.mxu1 %v3065_v55 }
 0x159   : > { %1950 = vmatprep.subr.bf16.mxu0 %v2975_v58  ;;  %1981 = vmatprep.subr.bf16.mxu1 %v2975_v58 }
 0x15b   : > { %1750 = vmatmul.mubr.f32.vlgmr.msra.gmra.mrb[0].mxu0 %v670_v18  ;;  %1806 = vmatmul.mubr.f32.vlgmr.msra.gmra.mrb[0].mxu1 %v895_v20  ;;  %v695_v1 = vpop.permute.xlu1 %694  ;;  %v3158_v17 = vpop.permute.xlu0 %734 }
 0x15c   : > { %1952 = vmatpush3.bf16.msra.mxu0 %v2975_v58  ;;  %1989 = vmatpush3.bf16.msra.mxu1 %v2975_v58  ;;  %v674_v58 = vld [vmem:[%s3412_s2 + $0x28] sm:$0xff] }
 0x15d   : > { %1954 = vmatprep.subr.bf16.mxu0 %v2985_v8  ;;  %1982 = vmatprep.subr.bf16.mxu1 %v2985_v8 }
 0x15e   : > { %1752 = vmatprep.mubr.f32.mxu0 %v671_v49  ;;  %1808 = vmatprep.mubr.f32.mxu1 %v896_v24 }
 0x15f   : > { %1753 = vmatmul.mubr.f32.gmra.mrb[2].mxu0 %v672_v63  ;;  %1809 = vmatmul.mubr.f32.gmra.mrb[2].mxu1 %v897_v5  ;;  %v699_v39 = vpop.permute.xlu1 %698 }
 0x160   : > { %1956 = vmatpush3.bf16.msra.mxu0 %v2985_v8  ;;  %1990 = vmatpush3.bf16.msra.mxu1 %v2985_v8  ;;  %v676_v8 = vld [vmem:[%s3412_s2 + $0x38] sm:$0xff] }
 0x161   : > { %1958 = vmatprep.subr.bf16.mxu0 %v2995_v14  ;;  %1983 = vmatprep.subr.bf16.mxu1 %v2995_v14 }
 0x162   : > { %1755 = vmatprep.mubr.f32.mxu0 %v673_v9  ;;  %1811 = vmatprep.mubr.f32.mxu1 %v898_v60 }
 0x163   : > { %1756 = vmatmul.mubr.f32.gmra.mrb[4].mxu0 %v674_v58  ;;  %1812 = vmatmul.mubr.f32.gmra.mrb[4].mxu1 %v899_v62  ;;  %v707_v22 = vpop.permute.xlu1 %706 }
 0x164   : > { %1960 = vmatpush3.bf16.msra.mxu0 %v2995_v14  ;;  %1991 = vmatpush3.bf16.msra.mxu1 %v2995_v14  ;;  %v678_v14 = vld [vmem:[%s3412_s2 + $0x48] sm:$0xff] }
 0x165   : > { %1962 = vmatprep.subr.bf16.mxu0 %v3010_v11  ;;  %1984 = vmatprep.subr.bf16.mxu1 %v3010_v11 }
 0x166   : > { %1758 = vmatprep.mubr.f32.mxu0 %v675_v13  ;;  %1814 = vmatprep.mubr.f32.mxu1 %v900_v12 }
 0x167   : > { %1759 = vmatmul.mubr.f32.gmra.mrb[6].mxu0 %v676_v8  ;;  %1815 = vmatmul.mubr.f32.gmra.mrb[6].mxu1 %v901_v16  ;;  %v715_v27 = vpop.permute.xlu1 %714 }
 0x168   : > { %1964 = vmatpush3.bf16.msra.mxu0 %v3010_v11  ;;  %1992 = vmatpush3.bf16.msra.mxu1 %v3010_v11  ;;  %v906_v11 = vld [vmem:[#allocation5 + $0x60] sm:$0xff] }
 0x169   : > { %1966 = vmatprep.subr.bf16.mxu0 %v3028_v15  ;;  %1985 = vmatprep.subr.bf16.mxu1 %v3028_v15 }
 0x16a   : > { %1761 = vmatprep.mubr.f32.mxu0 %v677_v26  ;;  %1817 = vmatprep.mubr.f32.mxu1 %v902_v25 }
 0x16b   : > { %1762 = vmatmul.mubr.f32.gmra.mrb[8].mxu0 %v678_v14  ;;  %1818 = vmatmul.mubr.f32.gmra.mrb[8].mxu1 %v903_v31  ;;  %v723_v56 = vpop.permute.xlu1 %722 }
 0x16c   : > { %1968 = vmatpush3.bf16.msra.mxu0 %v3028_v15  ;;  %1993 = vmatpush3.bf16.msra.mxu1 %v3028_v15  ;;  %v1058_v15 = vld [vmem:[#allocation7 + $0x18] sm:$0xff] }
 0x16d   : > { %1970 = vmatprep.subr.bf16.mxu0 %v3041_v28  ;;  %1986 = vmatprep.subr.bf16.mxu1 %v3041_v28 }
 0x16e   : > { %1764 = vmatprep.mubr.f32.mxu0 %v679_v30  ;;  %1820 = vmatprep.mubr.f32.mxu1 %v904_v37 }
 0x16f   : > { %1765 = vmatmul.mubr.f32.gmra.mrb[10].mxu0 %v680_v6  ;;  %1821 = vmatmul.mubr.f32.gmra.mrb[10].mxu1 %v905_v41 }
 0x170   : > { %1972 = vmatpush3.bf16.msra.mxu0 %v3041_v28  ;;  %1994 = vmatpush3.bf16.msra.mxu1 %v3041_v28  ;;  %v1070_v28 = vld [vmem:[#allocation7 + $0x78] sm:$0xff] }
 0x171   : > { %1974 = vmatprep.subr.bf16.mxu0 %v3055_v52  ;;  %1987 = vmatprep.subr.bf16.mxu1 %v3055_v52 }
 0x172   : > { %1767 = vmatprep.mubr.f32.mxu0 %v681_v42  ;;  %1823 = vmatprep.mubr.f32.mxu1 %v906_v11 }
 0x173   : > { %1768 = vmatmul.mubr.f32.gmra.mrb[12].mxu0 %v682_v33  ;;  %1824 = vmatmul.mubr.f32.gmra.mrb[12].mxu1 %v907_v43 }
 0x174   : > { %1976 = vmatpush3.bf16.msra.mxu0 %v3055_v52  ;;  %1995 = vmatpush3.bf16.msra.mxu1 %v3055_v52  ;;  %v3148_v52 = vpop.permute.xlu1 %730 }
 0x175   : > { %1978 = vmatprep.subr.bf16.mxu0 %v3065_v55  ;;  %1988 = vmatprep.subr.bf16.mxu1 %v3065_v55 }
 0x176   : > { %1770 = vmatprep.mubr.f32.mxu0 %v683_v35  ;;  %1826 = vmatprep.mubr.f32.mxu1 %v908_v44 }
 0x177   : > { %1771 = vmatmul.mubr.f32.gmra.mrb[14].mxu0 %v684_v32  ;;  %1827 = vmatmul.mubr.f32.gmra.mrb[14].mxu1 %v909_v53 }
 0x178   : > { %1980 = vmatpush3.bf16.msra.mxu0 %v3065_v55  ;;  %1996 = vmatpush3.bf16.msra.mxu1 %v3065_v55  ;;  %v3150_v45 = vpop.permute.xlu1 %738  ;;  %v3162_v55 = vpop.permute.xlu0 %742 }
 0x179   : > { %1861 = vmatprep.mubr.f32.mxu0 %v1055_v46  ;;  %1873 = vmatprep.mubr.f32.mxu1 %v1063_v48 }
 0x17b   : > { %1862 = vmatmul.mubr.f32.vlgmr.msra.gmra.mrb[16].mxu0 %v1056_v34  ;;  %1874 = vmatmul.mubr.f32.vlgmr.msra.gmra.mrb[16].mxu1 %v1064_v51 }
 0x17c   : > { %1864 = vmatprep.mubr.f32.mxu0 %v1057_v19  ;;  %1876 = vmatprep.mubr.f32.mxu1 %v1065_v2  ;;  %v3154_v7 = vpop.permute.xlu1 %746 }
 0x17f   : > { %1865 = vmatmul.mubr.f32.gmra.mrb[18].mxu0 %v1058_v15  ;;  %1877 = vmatmul.mubr.f32.gmra.mrb[18].mxu1 %v1066_v36 }
 0x180   : > { %1867 = vmatprep.mubr.f32.mxu0 %v1059_v57  ;;  %1879 = vmatprep.mubr.f32.mxu1 %v1067_v54 }
 0x183   : > { %1868 = vmatmul.mubr.f32.gmra.mrb[20].mxu0 %v1060_v4  ;;  %1880 = vmatmul.mubr.f32.gmra.mrb[20].mxu1 %v1068_v10 }
 0x184   : > { %1870 = vmatprep.mubr.f32.mxu0 %v1061_v29  ;;  %1882 = vmatprep.mubr.f32.mxu1 %v1069_v23 }
 0x187   : > { %1871 = vmatmul.mubr.f32.gmra.mrb[22].mxu0 %v1062_v61  ;;  %1883 = vmatmul.mubr.f32.gmra.mrb[22].mxu1 %v1070_v28 }
 0x19f   : > { %v3156_v50 = vpop.permute.xlu1 %1076  ;;  %v3170_v60 = vpop.permute.xlu0 %1072 }
 0x1a3   : > { %v3160_v21 = vpop.permute.xlu1 %1080  ;;  %v3174_v26 = vpop.permute.xlu0 %1084 }
 0x1a8   : > { %v3164_v9 = vpop.permute.xlu1 %1088  ;;  %v3180_v42 = vpop.permute.xlu0 %1092 }
 0x1ac   : > { %v3178_v41 = vpop.permute.xlu1 %1096  ;;  %v3184_v53 = vpop.permute.xlu0 %1100 }
 0x1b0   : > { %v1105_v15 = vpop.permute.xlu1 %1104  ;;  %v1109_v36 = vpop.permute.xlu0 %1108 }
 0x22e   : > { %v1807_v18 = vpop.f32.mrb[0].mxu1  ;;  %v1751_v20 = vpop.f32.mrb[0].mxu0 }
 0x22f   : > { %v976_v49 = vpop.f32.mrb[1].mxu1  ;;  %v815_v24 = vpop.f32.mrb[1].mxu0  ;;  %v821_v63 = vadd.f32 %v1751_v20, %v691_v38 }
 0x230   : > { %1296 = vxpose.xlu1.b32.start [1/16] %v976_v49, 128  ;;  %v816_v5 = vadd.f32 %v815_v24, %v687_v0  ;;  %v1113_v38 = vpop.permute.xlu1 %1112 }
 0x231   : > { %1281 = vst [vmem:[%s3167_s3 + $0x8] sm:$0xff] %v821_v63 }
 0x232   : > { %v1810_v58 = vpop.f32.mrb[2].mxu1  ;;  %1280 = vst [vmem:[%s3167_s3] sm:$0xff] %v816_v5  ;;  %v1754_v62 = vpop.f32.mrb[2].mxu0 }
 0x233   : > { %v986_v13 = vpop.f32.mrb[3].mxu1  ;;  %v831_v12 = vadd.f32 %v1754_v62, %v699_v39  ;;  %v825_v8 = vpop.f32.mrb[3].mxu0 }
 0x234   : > { %1297 = vxpose.xlu1.b32.cont [2/16] %v1807_v18, 128  ;;  %v826_v16 = vadd.f32 %v825_v8, %v695_v1 }
 0x235   : > { %1283 = vst [vmem:[%s3167_s3 + $0x18] sm:$0xff] %v831_v12 }
 0x236   : > { %1282 = vst [vmem:[%s3167_s3 + $0x10] sm:$0xff] %v826_v16  ;;  %v1813_v25 = vpop.f32.mrb[4].mxu1  ;;  %v1757_v14 = vpop.f32.mrb[4].mxu0 }
 0x237   : > { %v841_v31 = vadd.f32 %v1757_v14, %v707_v22  ;;  %v996_v30 = vpop.f32.mrb[5].mxu1  ;;  %v835_v37 = vpop.f32.mrb[5].mxu0 }
 0x238   : > { %1298 = vxpose.xlu1.b32.cont [3/16] %v986_v13, 128  ;;  %v836_v6 = vadd.f32 %v835_v37, %v703_v40 }
 0x239   : > { %1285 = vst [vmem:[%s3167_s3 + $0x28] sm:$0xff] %v841_v31 }
 0x23a   : > { %v1760_v11 = vpop.f32.mrb[6].mxu0  ;;  %v1816_v33 = vpop.f32.mrb[6].mxu1  ;;  %1284 = vst [vmem:[%s3167_s3 + $0x20] sm:$0xff] %v836_v6 }
 0x23b   : > { %v851_v43 = vadd.f32 %v1760_v11, %v715_v27  ;;  %v845_v35 = vpop.f32.mrb[7].mxu0  ;;  %v1006_v44 = vpop.f32.mrb[7].mxu1 }
 0x23c   : > { %1299 = vxpose.xlu1.b32.cont [4/16] %v1810_v58, 128  ;;  %v846_v32 = vadd.f32 %v845_v35, %v711_v3  ;;  %v1117_v27 = vpop.permute.xlu0 %1116 }
 0x23d   : > { %1287 = vst [vmem:[%s3167_s3 + $0x38] sm:$0xff] %v851_v43 }
 0x23e   : > { %v1763_v46 = vpop.f32.mrb[8].mxu0  ;;  %v1819_v48 = vpop.f32.mrb[8].mxu1  ;;  %1286 = vst [vmem:[%s3167_s3 + $0x30] sm:$0xff] %v846_v32 }
 0x23f   : > { %v861_v34 = vadd.f32 %v1763_v46, %v723_v56  ;;  %v855_v51 = vpop.f32.mrb[9].mxu0  ;;  %v1016_v19 = vpop.f32.mrb[9].mxu1 }
 0x240   : > { %1300 = vxpose.xlu1.b32.cont [5/16] %v996_v30, 128  ;;  %v856_v2 = vadd.f32 %v855_v51, %v719_v59 }
 0x241   : > { %1289 = vst [vmem:[%s3167_s3 + $0x48] sm:$0xff] %v861_v34 }
 0x242   : > { %v1766_v57 = vpop.f32.mrb[10].mxu0  ;;  %v3188_v54 = vpop.f32.mrb[10].mxu1  ;;  %1288 = vst [vmem:[%s3167_s3 + $0x40] sm:$0xff] %v856_v2 }
 0x243   : > { %v871_v4 = vadd.f32 %v1766_v57, %v3148_v52  ;;  %v865_v10 = vpop.f32.mrb[11].mxu0  ;;  %v1026_v29 = vpop.f32.mrb[11].mxu1 }
 0x244   : > { %1301 = vxpose.xlu1.b32.cont [6/16] %v1813_v25, 128  ;;  %v866_v23 = vadd.f32 %v865_v10, %v3152_v47 }
 0x245   : > { %1291 = vst [vmem:[%s3167_s3 + $0x58] sm:$0xff] %v871_v4 }
 0x246   : > { %v1769_v61 = vpop.f32.mrb[12].mxu0  ;;  %v3194_v28 = vpop.f32.mrb[12].mxu1  ;;  %1290 = vst [vmem:[%s3167_s3 + $0x50] sm:$0xff] %v866_v23 }
 0x247   : > { %v881_v0 = vadd.f32 %v1769_v61, %v3150_v45  ;;  %v875_v1 = vpop.f32.mrb[13].mxu0  ;;  %v3198_v39 = vpop.f32.mrb[13].mxu1 }
 0x248   : > { %1302 = vxpose.xlu1.b32.cont [7/16] %v1006_v44, 128  ;;  %v876_v22 = vadd.f32 %v875_v1, %v3158_v17 }
 0x249   : > { %1293 = vst [vmem:[%s3167_s3 + $0x68] sm:$0xff] %v881_v0 }
 0x24a   : > { %v1772_v40 = vpop.f32.mrb[14].mxu0  ;;  %v3202_v56 = vpop.f32.mrb[14].mxu1  ;;  %1292 = vst [vmem:[%s3167_s3 + $0x60] sm:$0xff] %v876_v22 }
 0x24b   : > { %v891_v3 = vadd.f32 %v1772_v40, %v3154_v7  ;;  %v885_v52 = vpop.f32.mrb[15].mxu0  ;;  %v3206_v59 = vpop.f32.mrb[15].mxu1 }
 0x24c   : > { %1303 = vxpose.xlu1.b32.cont [8/16] %v1816_v33, 128  ;;  %v886_v45 = vadd.f32 %v885_v52, %v3162_v55  ;;  %v1121_v55 = vpop.permute.xlu1 %1120 }
 0x24d   : > { %1295 = vst [vmem:[%s3167_s3 + $0x78] sm:$0xff] %v891_v3 }
 0x24e   : > { %v1863_v47 = vpop.f32.mrb[16].mxu0  ;;  %v1875_v18 = vpop.f32.mrb[16].mxu1  ;;  %1294 = vst [vmem:[%s3167_s3 + $0x70] sm:$0xff] %v886_v45 }
 0x24f   : > { %v1207_v17 = vadd.f32 %v1863_v47, %v3156_v50  ;;  %v1201_v20 = vpop.f32.mrb[17].mxu0  ;;  %v1241_v49 = vpop.f32.mrb[17].mxu1  ;;  %v1247_v24 = vadd.f32 %v1875_v18, %v1109_v36 }
 0x250   : > { %1304 = vxpose.xlu1.b32.cont [9/16] %v1016_v19, 128  ;;  %v1242_v63 = vadd.f32 %v1241_v49, %v1105_v15  ;;  %v1202_v7 = vadd.f32 %v1201_v20, %v3170_v60  ;;  %v1125_v50 = vpop.permute.xlu0 %1124  ;;  %v1129_v33 = vpop.permute.xlu1 %1128 }
 0x251   : > { %1345 = vst [vmem:[%s3214_s16 + $0x8] sm:$0xff] %v1207_v17  ;;  %1353 = vst [vmem:[%s3214_s16 + $0x48] sm:$0xff] %v1247_v24 }
 0x252   : > { %1352 = vst [vmem:[%s3214_s16 + $0x40] sm:$0xff] %v1242_v63  ;;  %v1866_v5 = vpop.f32.mrb[18].mxu0  ;;  %v1878_v58 = vpop.f32.mrb[18].mxu1  ;;  %1344 = vst [vmem:[%s3214_s16] sm:$0xff] %v1202_v7 }
 0x253   : > { %v1211_v62 = vpop.f32.mrb[19].mxu0  ;;  %v1251_v60 = vpop.f32.mrb[19].mxu1  ;;  %v1217_v13 = vadd.f32 %v1866_v5, %v3174_v26  ;;  %v1257_v12 = vadd.f32 %v1878_v58, %v1117_v27 }
 0x254   : > { %1305 = vxpose.xlu1.b32.cont [10/16] %v1819_v48, 128  ;;  %v1212_v8 = vadd.f32 %v1211_v62, %v3160_v21  ;;  %v1252_v16 = vadd.f32 %v1251_v60, %v1113_v38  ;;  %v1133_v11 = vpop.permute.xlu0 %1132 }
 0x255   : > { %1347 = vst [vmem:[%s3214_s16 + $0x18] sm:$0xff] %v1217_v13  ;;  %1355 = vst [vmem:[%s3214_s16 + $0x58] sm:$0xff] %v1257_v12 }
 0x256   : > { %1346 = vst [vmem:[%s3214_s16 + $0x10] sm:$0xff] %v1212_v8  ;;  %1354 = vst [vmem:[%s3214_s16 + $0x50] sm:$0xff] %v1252_v16  ;;  %v1869_v25 = vpop.f32.mrb[20].mxu0  ;;  %v1881_v14 = vpop.f32.mrb[20].mxu1 }
 0x257   : > { %v1221_v31 = vpop.f32.mrb[21].mxu0  ;;  %v1261_v30 = vpop.f32.mrb[21].mxu1  ;;  %v1227_v37 = vadd.f32 %v1869_v25, %v3180_v42  ;;  %v1267_v26 = vadd.f32 %v1881_v14, %v1125_v50 }
 0x258   : > { %1306 = vxpose.xlu1.b32.cont [11/16] %v1026_v29, 128  ;;  %v1222_v6 = vadd.f32 %v1221_v31, %v3164_v9  ;;  %v1262_v21 = vadd.f32 %v1261_v30, %v1121_v55 }
 0x259   : > { %1349 = vst [vmem:[%s3214_s16 + $0x28] sm:$0xff] %v1227_v37  ;;  %1357 = vst [vmem:[%s3214_s16 + $0x68] sm:$0xff] %v1267_v26 }
 0x25a   : > { %1348 = vst [vmem:[%s3214_s16 + $0x20] sm:$0xff] %v1222_v6  ;;  %1356 = vst [vmem:[%s3214_s16 + $0x60] sm:$0xff] %v1262_v21  ;;  %v1872_v43 = vpop.f32.mrb[22].mxu0  ;;  %v1884_v35 = vpop.f32.mrb[22].mxu1 }
 0x25b   : > { %v1231_v44 = vpop.f32.mrb[23].mxu0  ;;  %v1271_v42 = vpop.f32.mrb[23].mxu1  ;;  %v1237_v9 = vadd.f32 %v1872_v43, %v3184_v53  ;;  %v1277_v32 = vadd.f32 %v1884_v35, %v1133_v11 }
 0x25c   : > { %1307 = vxpose.xlu1.b32.cont [12/16] %v3188_v54, 128  ;;  %v1232_v46 = vadd.f32 %v1231_v44, %v3178_v41  ;;  %v1272_v48 = vadd.f32 %v1271_v42, %v1129_v33 }
 0x25d   : > { %1351 = vst [vmem:[%s3214_s16 + $0x38] sm:$0xff] %v1237_v9  ;;  %1359 = vst [vmem:[%s3214_s16 + $0x78] sm:$0xff] %v1277_v32 }
 0x25e   : > { %1350 = vst [vmem:[%s3214_s16 + $0x30] sm:$0xff] %v1232_v46  ;;  %1358 = vst [vmem:[%s3214_s16 + $0x70] sm:$0xff] %v1272_v48 }
 0x260   : > { %1308 = vxpose.xlu1.b32.cont [13/16] %v3198_v39, 128 }
 0x264   : > { %1309 = vxpose.xlu1.b32.cont [14/16] %v3194_v28, 128 }
 0x268   : > { %1310 = vxpose.xlu1.b32.cont [15/16] %v3206_v59, 128 }
 0x26c   : > { %1311 = vxpose.xlu1.b32.end [16/16] %v3202_v56, 128 }
 0x26d   : > { %2239 = shalt.err (!%p2236_p0)
}
 0x26e   : > { %s2240_s3 = scalar_lea.hbm %s3255_s12, 2048  ;;  %s2244_s21 = scalar_lea.hbm %s3415_s5, 8192 }
 0x26f   : > { %p2241_p4 = scmp.ne.s32.totalorder %s3255_s12, %s2240_s3  ;;  %p2245_p2 = scmp.lt.u32.totalorder %s3255_s12, %s3415_s5 }
 0x270   : > { %p2246_p1 = scmp.lt.u32.totalorder %s2244_s21, %s2240_s3  ;;  %p2248_p13 = scmp.lt.u32.totalorder %s2240_s3, %s3255_s12 }
 0x271   : > { %p2242_p10 = pnand %p2241_p4, %p3456_p3 }
 0x272   : > { %p2247_p12 = por %p2246_p1, %p2245_p2 }
 0x273   : > { %p2243_p11 = pneg %p2242_p10 }
 0x274   : > { %p2249_p7 = por %p2248_p13, %p2247_p12 }
 0x276   : > { %p2250_p6 = pnand %p2249_p7, %p2243_p11 }
 0x278   : > { %2253 = shalt.err (!%p2250_p6)
}
 0x279   : > { %s3433_s13 = smov 128   ;;  %s3432_s23 = smov 256  }
 0x27a   : > { %s2403_s20 = smov 8   ;;  %s3457_s18 = scalar_lea.sflag [#allocation4], %s2665_s19 }
 0x27b   : > { %2007 = dma.vmem_to_hbm [thread:$0]  (%p3456_p3), %s3258_s6, 2048, %s3255_s12, %s3457_s18, %s3433_s13, %s3432_s23, %s2403_s20  }
 0x27c   : > { %s3288_s15 = scalar_lea.vmem [#allocation9], %s2668_s22  ;;  %s1614_s19 = sshll.u32 %s2372_s27, 4 }
 0x27d   : > { %s3458_s22 = sshll.u32 %s2376_s28, 5  ;;  %s1365_s6 = sand.u32 1, %s2487_s9  }
 0x27e   : > { %s1400_s12 = sadd.s32 %s1614_s19, %s3458_s22  ;;  %s1403_s11 = sshll.u32 %s3288_s15, 4  ;;  %s3316_s11 = int_to_ptr.vmem [resolvable:$true] %s1403_s11 }
 0x27f   : > { %s1616_s3 = sshll.u32 %s1400_s12, 7  ;;  %s1420_s21 = sshll.u32 %s3214_s16, 4  ;;  %s3325_s21 = int_to_ptr.vmem [resolvable:$true] %s1420_s21 }
 0x280   : > { %s3459_s23 = sld [smem:[#allocation20_spill]]  ;;  %s3460_s27 = sshll.u32 %s3247_s10, 7 }
 0x281   : > { %s3461_s9 = sld [smem:[#allocation21_spill]]  ;;  %s3328_s16 = scalar_lea.sflag [#allocation10], %s1365_s6 }
 0x282   : > { %s2254_s12 = scalar_lea.vmem %s3316_s11, 2048 }
 0x283   : > { %p2255_p8 = scmp.ne.s32.totalorder %s3316_s11, %s2254_s12 }
 0x285   : > { %p2256_p9 = pnand %p2255_p8, %p3456_p3 }
 0x286   : > { %s3314_s13 = scalar_lea.hbm %s3459_s23, %s1616_s3  ;;  %s2404_s3 = smov [#allocation9]  }
 0x287   : > { %s3323_s22 = scalar_lea.hbm %s3461_s9, %s3460_s27  ;;  %p2257_p5 = pneg %p2256_p9 }
 0x288   : > { %s2258_s17 = sshll.u32 %s2404_s3, 4  ;;  %s2259_s17 = int_to_ptr.vmem [resolvable:$false] %s2258_s17 }
 0x289   : > { %s2260_s18 = scalar_lea.vmem %s2259_s17, 4096  ;;  %p2261_p0 = scmp.lt.s32.totalorder %s3316_s11, %s2259_s17 }
 0x28a   : > { %p2262_p4 = scmp.lt.s32.totalorder %s2260_s18, %s2254_s12 }
 0x28c   : > { %p2263_p10 = por %p2262_p4, %p2261_p0 }
 0x28e   : > { %p2264_p11 = pnand %p2263_p10, %p2257_p5 }
 0x2b0   : > { %v1312_v41 = vpop.trf.xlu1 }
 0x2b1   : > { %1328 = vst [vmem:[%s3288_s15] sm:$0xff] %v1312_v41 }
 0x2b4   : > { %v1313_v53 = vpop.trf.xlu1 }
 0x2b5   : > { %1329 = vst [vmem:[%s3288_s15 + $0x8] sm:$0xff] %v1313_v53 }
 0x2b8   : > { %v1314_v34 = vpop.trf.xlu1 }
 0x2b9   : > { %1330 = vst [vmem:[%s3288_s15 + $0x10] sm:$0xff] %v1314_v34 }
 0x2bc   : > { %v1315_v51 = vpop.trf.xlu1 }
 0x2bd   : > { %1331 = vst [vmem:[%s3288_s15 + $0x18] sm:$0xff] %v1315_v51 }
 0x2c0   : > { %v1316_v19 = vpop.trf.xlu1 }
 0x2c1   : > { %1332 = vst [vmem:[%s3288_s15 + $0x20] sm:$0xff] %v1316_v19 }
 0x2c4   : > { %v1317_v2 = vpop.trf.xlu1 }
 0x2c5   : > { %1333 = vst [vmem:[%s3288_s15 + $0x28] sm:$0xff] %v1317_v2 }
 0x2c8   : > { %v1318_v15 = vpop.trf.xlu1 }
 0x2c9   : > { %1334 = vst [vmem:[%s3288_s15 + $0x30] sm:$0xff] %v1318_v15 }
 0x2cc   : > { %v1319_v36 = vpop.trf.xlu1 }
 0x2cd   : > { %1335 = vst [vmem:[%s3288_s15 + $0x38] sm:$0xff] %v1319_v36 }
 0x2d0   : > { %v1320_v57 = vpop.trf.xlu1 }
 0x2d1   : > { %1336 = vst [vmem:[%s3288_s15 + $0x40] sm:$0xff] %v1320_v57 }
 0x2d4   : > { %v1321_v54 = vpop.trf.xlu1 }
 0x2d5   : > { %1337 = vst [vmem:[%s3288_s15 + $0x48] sm:$0xff] %v1321_v54 }
 0x2d8   : > { %v1322_v4 = vpop.trf.xlu1 }
 0x2d9   : > { %1338 = vst [vmem:[%s3288_s15 + $0x50] sm:$0xff] %v1322_v4 }
 0x2dc   : > { %v1323_v10 = vpop.trf.xlu1 }
 0x2dd   : > { %1339 = vst [vmem:[%s3288_s15 + $0x58] sm:$0xff] %v1323_v10 }
 0x2e0   : > { %v1324_v29 = vpop.trf.xlu1 }
 0x2e1   : > { %1340 = vst [vmem:[%s3288_s15 + $0x60] sm:$0xff] %v1324_v29 }
 0x2e4   : > { %v1325_v23 = vpop.trf.xlu1 }
 0x2e5   : > { %1341 = vst [vmem:[%s3288_s15 + $0x68] sm:$0xff] %v1325_v23 }
 0x2e8   : > { %v1326_v61 = vpop.trf.xlu1 }
 0x2e9   : > { %1342 = vst [vmem:[%s3288_s15 + $0x70] sm:$0xff] %v1326_v61 }
 0x2ec   : > { %v1327_v28 = vpop.trf.xlu1 }
 0x2ed   : > { %1343 = vst [vmem:[%s3288_s15 + $0x78] sm:$0xff] %v1327_v28 }
 0x2ee   : > { %2267 = shalt.err (!%p2264_p11)
}
 0x2ef   : > { %s2268_s10 = scalar_lea.hbm %s3314_s13, 2048  ;;  %s2272_s27 = scalar_lea.hbm %s3459_s23, 8192 }
 0x2f0   : > { %p2269_p2 = scmp.ne.s32.totalorder %s3314_s13, %s2268_s10  ;;  %p2273_p13 = scmp.lt.u32.totalorder %s3314_s13, %s3459_s23 }
 0x2f1   : > { %p2274_p7 = scmp.lt.u32.totalorder %s2272_s27, %s2268_s10  ;;  %p2276_p8 = scmp.lt.u32.totalorder %s2268_s10, %s3314_s13 }
 0x2f2   : > { %p2270_p1 = pnand %p2269_p2, %p3456_p3 }
 0x2f3   : > { %p2275_p6 = por %p2274_p7, %p2273_p13 }
 0x2f4   : > { %p2271_p12 = pneg %p2270_p1 }
 0x2f5   : > { %p2277_p9 = por %p2276_p8, %p2275_p6 }
 0x2f7   : > { %p2278_p5 = pnand %p2277_p9, %p2271_p12 }
 0x2f9   : > { %2281 = shalt.err (!%p2278_p5)
}
 0x2fa   : > { %s3462_s12 = smov 128   ;;  %s2282_s3 = scalar_lea.vmem %s3325_s21, 2048 }
 0x2fb   : > { %2008 = dma.vmem_to_hbm [thread:$0]  (%p3456_p3), %s3316_s11, 2048, %s3314_s13, %s3328_s16, %s3462_s12, %s3462_s12, %s2403_s20  }
 0x2fc   : > { %p2283_p0 = scmp.ne.s32.totalorder %s3325_s21, %s2282_s3  ;;  %s2405_s17 = smov [#allocation11]  }
 0x2fd   : > { %s2286_s18 = sshll.u32 %s2405_s17, 4  ;;  %s2287_s18 = int_to_ptr.vmem [resolvable:$false] %s2286_s18 }
 0x2fe   : > { %p2284_p4 = pnand %p2283_p0, %p3456_p3  ;;  %s2288_s10 = scalar_lea.vmem %s2287_s18, 4096 }
 0x2ff   : > { %p2289_p11 = scmp.lt.s32.totalorder %s3325_s21, %s2287_s18  ;;  %p2290_p2 = scmp.lt.s32.totalorder %s2288_s10, %s2282_s3 }
 0x300   : > { %p2285_p10 = pneg %p2284_p4 }
 0x301   : > { %p2291_p1 = por %p2290_p2, %p2289_p11 }
 0x303   : > { %p2292_p12 = pnand %p2291_p1, %p2285_p10 }
 0x305   : > { %2295 = shalt.err (!%p2292_p12)
}
 0x306   : > { %s2296_s13 = scalar_lea.hbm %s3323_s22, 2048  ;;  %s2300_s6 = scalar_lea.hbm %s3461_s9, 8192 }
 0x307   : > { %p2297_p13 = scmp.ne.s32.totalorder %s3323_s22, %s2296_s13  ;;  %p2301_p8 = scmp.lt.u32.totalorder %s3323_s22, %s3461_s9 }
 0x308   : > { %p2302_p9 = scmp.lt.u32.totalorder %s2300_s6, %s2296_s13  ;;  %p2304_p0 = scmp.lt.u32.totalorder %s2296_s13, %s3323_s22 }
 0x309   : > { %p2298_p7 = pnand %p2297_p13, %p3456_p3 }
 0x30a   : > { %p2303_p5 = por %p2302_p9, %p2301_p8 }
 0x30b   : > { %p2299_p6 = pneg %p2298_p7 }
 0x30c   : > { %p2305_p4 = por %p2304_p0, %p2303_p5 }
 0x30e   : > { %p2306_p10 = pnand %p2305_p4, %p2299_p6 }
 0x310   : > { %2309 = shalt.err (!%p2306_p10)
}
 0x311   : > { %s3463_s19 = smov 256  }
 0x312   : > { %2009 = dma.vmem_to_hbm [thread:$0]  (%p3456_p3), %s3325_s21, 2048, %s3323_s22, %s3328_s16, %s3462_s12, %s3463_s19, %s2403_s20  }
 0x313 PF: > { %s3464_s3 = sld [smem:[#allocation17_spill]]  ;;  %s3465_s17 = sld [smem:[#allocation16_spill]] }
 0x314   : > { %s3466_s18 = sld [smem:[#allocation18_spill]] }
 0x319   : > { %p2039_p11 = scmp.ge.s32.totalorder %s3464_s3, 2  ;;  %s1435_s10 = sand.u32 1, %s3465_s17  }
 0x31a   : > { %p3467_p2 = scmp.ne.s32.totalorder %s3466_s18, 0  ;;  %s1436_s13 = scalar_lea.sflag [#allocation4], %s1435_s10 }
 0x31c   : > { %p2025_p1 = pnand %p2039_p11, %p3467_p2 }
 0x31e   : > { %2351 = dma.done.wait (!%p2025_p1), %s1436_s13, 2048  }
 0x31f   : > { %2353 = vsyncadd (!%p2025_p1), %s1436_s13, 4294965248  ;;  %s3468_s14 = sadd.s32 4294967294, %s3464_s3  }
 0x320   : > { %s1444_s11 = sand.u32 1, %s3468_s14  }
 0x321   : > { %s1445_s15 = scalar_lea.sflag [#allocation10], %s1444_s11 }
 0x322   : > { %2355 = dma.done.wait (!%p2025_p1), %s1445_s15, 4096  }
 0x323   : > { %2357 = vsyncadd (!%p2025_p1), %s1445_s15, 4294963200  ;;  %s28_s6 = sadd.s32 1, %s3464_s3   ;;  %s3469_s20 = smov %s3479_s24 }
 0x324   : > { %p25_p3 = scmp.ge.s32.totalorder %s28_s6, 6   ;;  %s3470_s24 = smov %s2364_s25 }
 0x325   : > { %s3471_s25 = smov %s2368_s26  ;;  %s3472_s26 = smov %s2660_s7 }
 0x326   : > { %s3473_s27 = smov %s2380_s29  ;;  %s3474_s28 = smov %s2384_s30 }
 0x327   : > { %s3475_s29 = smov %s3469_s20  ;;  %s3476_s30 = smov %s3483_s8 }
 0x328   : > { %s3477_s8 = smov %s28_s6  ;;  %27 = sbr.rel (!%p25_p3) target bundleno = 14 (0xe), region = 125 }
 0x32f   :  { %1459 = vsyncpa [#allocation3], 1 }
 0x330   :  { %1461 = vsyncpa [#allocation3 + $0x1], 1 }
 0x331   :  { %1462 = vsyncpa [#allocation6], 1 }
 0x332   :  { %1463 = vsyncpa [#allocation4], 1 }
 0x333   :  { %1465 = vsyncpa [#allocation4 + $0x1], 1 }
 0x334   :  { %1466 = vsyncpa [#allocation10], 1 }
 0x335   :  { %1468 = vsyncpa [#allocation10 + $0x1], 1 }

</bundles_post_ra>
